<compile_context>
chip_gen: v7x
topology: tpu7x:2x2x1
jax: 0.10.0
libtpu: 0.0.40
codegen_flags: <defaults>
</compile_context>

<pallas_src>
import functools

import jax
import jax.numpy as jnp
import numpy as np
from jax import lax
from jax.experimental import pallas as pl
from jax.experimental.pallas import tpu as pltpu

NUM_HEADS = 8


def mha_kernel(x_ref, wq_ref, wk_ref, wv_ref, bq_ref, bk_ref, bv_ref, o_ref,
               k_s, v_s, *, num_heads, q_tile, kv_chunk, approx_recip):
    """One grid step == (batch element b, query tile qi).

    x_ref  : (1, S, D) VMEM  — full sequence of x for batch b (index_map is
                               constant over qi, so fetched once per batch elem)
    wq_ref : (D, D)    VMEM  — pre-transposed Wq with 1/sqrt(hd) folded in
    wk_ref : (D, D)    VMEM  — pre-transposed Wk
    wv_ref : (D, D)    VMEM  — pre-transposed Wv
    b*_ref : (1, D) f32 VMEM — biases (b_q pre-scaled)
    o_ref  : (1, TQ, D) VMEM — output query tile
    k_s,v_s: (H, S, hd) VMEM scratch — head-major K/V cache, persists over qi
    """
    qi = pl.program_id(1)

    S, D = x_ref.shape[1], x_ref.shape[2]
    H = num_heads
    hd = D // H
    TQ = q_tile
    TK = kv_chunk
    n_kv = S // TK
    cdtype = x_ref.dtype                 # MXU operand dtype (f32 or bf16)

    # ---- K/V projection + head-major relayout: ONCE per batch element -------
    # (query-tile axis is the inner "arbitrary" grid axis; scratch persists).
    @pl.when(qi == 0)
    def _():
        x_full = x_ref[0]                                             # (S, D)
        # Two sequential (S, D) dots written straight into scratch — the
        # (S, 2D) f32 transient of a fused K|V projection is never live.
        k = jnp.dot(x_full, wk_ref[...], preferred_element_type=jnp.float32)
        k = (k + bk_ref[...]).astype(cdtype)                          # (S, D)
        for h in range(H):                                            # head-major
            k_s[h] = k[:, h * hd:(h + 1) * hd]
        v = jnp.dot(x_full, wv_ref[...], preferred_element_type=jnp.float32)
        v = (v + bv_ref[...]).astype(cdtype)                          # (S, D)
        for h in range(H):
            v_s[h] = v[:, h * hd:(h + 1) * hd]

    # ---- Q projection for this query tile (sliced from the single x block;
    #      the 1/sqrt(hd) scale is already folded into wq/bq in the wrapper) --
    q_start = pl.multiple_of(qi * TQ, TQ)
    x_q = x_ref[0, pl.ds(q_start, TQ), :]                             # (TQ, D)
    q = jnp.dot(x_q, wq_ref[...], preferred_element_type=jnp.float32)
    q = (q + bq_ref[...]).astype(cdtype)                              # (TQ, D)
    # TODO(synk): replace the per-head lane slices below with a single
    # pltpu.einshape('q(hd)->hqd') relayout once grouped-dim equations are
    # verified on the target jax build (the K/V relayout is already hoisted).
    qh = jnp.stack([q[:, h * hd:(h + 1) * hd] for h in range(H)], axis=0)  # (H,TQ,hd)

    # ---- Flash-style attention over KV chunks (online softmax, all f32) -----
    def kv_step(ci, carry):
        m, l, acc = carry
        k_start = pl.multiple_of(ci * TK, TK)
        kh = k_s[:, pl.ds(k_start, TK), :]                            # (H, TK, hd)
        vh = v_s[:, pl.ds(k_start, TK), :]                            # (H, TK, hd)
        s = jnp.einsum('hqd,hkd->hqk', qh, kh,
                       preferred_element_type=jnp.float32)            # (H, TQ, TK)
        m_new = jnp.maximum(m, jnp.max(s, axis=-1, keepdims=True))
        alpha = jnp.exp(m - m_new)
        p = jnp.exp(s - m_new)
        l_new = alpha * l + jnp.sum(p, axis=-1, keepdims=True)
        acc_new = alpha * acc + jnp.einsum('hqk,hkd->hqd',
                                           p.astype(cdtype), vh,
                                           preferred_element_type=jnp.float32)
        return m_new, l_new, acc_new

    carry0 = (jnp.full((H, TQ, 1), -jnp.inf, jnp.float32),
              jnp.zeros((H, TQ, 1), jnp.float32),
              jnp.zeros((H, TQ, hd), jnp.float32))
    _, l, acc = lax.fori_loop(0, n_kv, kv_step, carry0, unroll=(n_kv <= 2))

    # ---- Normalize (EUP reciprocal), merge heads, ONE lane-dense store -------
    out = acc * pl.reciprocal(l, approx=approx_recip)                 # (H, TQ, hd)
    o = jnp.concatenate([out[h] for h in range(H)], axis=-1)          # (TQ, D)
    o_ref[0] = o.astype(o_ref.dtype)


def multi_head_attention(x, wq, wk, wv, bq, bk, bv, num_heads=NUM_HEADS,
                         q_tile=None, kv_chunk=None):
    B, S, D = x.shape
    assert D % num_heads == 0, "in_dim must be divisible by num_heads"
    H = num_heads
    hd = D // H

    # Query tile: 128 keeps double-buffering alive under v7x's 64 MiB VMEM and
    # is full-height for v5e's 128-wide MXU; full S for small sequences.
    if q_tile is None:
        q_tile = 128 if S % 128 == 0 else S
    if S % q_tile != 0:
        q_tile = S            # TODO(synk): pad ragged sequence lengths instead.
    n_q = S // q_tile

    # KV chunk for the in-kernel online-softmax loop: bounds live f32 scores
    # to (H, q_tile, kv_chunk) instead of (H, q_tile, S).
    if kv_chunk is None:
        kv_chunk = 512 if S % 512 == 0 else S
    if S % kv_chunk != 0:
        kv_chunk = S

    cdtype = x.dtype
    scale = 1.0 / (hd ** 0.5)
    # Wrapper-side constant folding / layout plumbing (done once, not per tile):
    #   * pre-transpose weights so the kernel computes x @ W^T directly
    #   * fold the 1/sqrt(head_dim) score scale into Wq^T and b_q
    #   * biases kept in f32 (added once per projection, in f32)
    wq_t = (wq.T * scale).astype(cdtype)                               # (D, D)
    wk_t = wk.T.astype(cdtype)                                         # (D, D)
    wv_t = wv.T.astype(cdtype)                                         # (D, D)
    bq_f = bq.astype(jnp.float32) * scale                              # (1, D)
    bk_f = bk.astype(jnp.float32)                                      # (1, D)
    bv_f = bv.astype(jnp.float32)                                      # (1, D)

    # Rough VMEM working-set estimate -> explicit scoped-VMEM limit (covers
    # v5e's 16 MiB scoped default; request stays under v7x's 64 MiB physical).
    def _pad(r, c, itemsize):
        return (-(-r // 8) * 8) * (-(-c // 128) * 128) * itemsize

    isz = jnp.dtype(cdtype).itemsize
    osz = jnp.dtype(x.dtype).itemsize
    working_set = (
        2 * _pad(S, D, isz)                      # x block (double-buffered)
        + 2 * 3 * _pad(D, D, isz)                # Wq/Wk/Wv (double-buffered)
        + 2 * 3 * _pad(1, D, 4)                  # biases
        + 2 * _pad(q_tile, D, osz)               # output tile
        + 2 * H * _pad(S, hd, isz)               # K/V scratch (single copy)
        + H * _pad(q_tile, kv_chunk, 4)          # live f32 score chunk
        + 2 * H * _pad(q_tile, hd, 4)            # online-softmax acc / p@v
    )
    vmem_limit = int(min(64 * 1024 * 1024, max(32 * 1024 * 1024, 2 * working_set)))

    kernel = functools.partial(
        mha_kernel, num_heads=H, q_tile=q_tile, kv_chunk=kv_chunk,
        # EUP approximate reciprocal only on the bf16 fast path; exact divide
        # keeps the f32 path within 1e-5 of the reference.
        approx_recip=(cdtype == jnp.bfloat16))

    # TODO(synk): on v7x with small/odd B, add an explicit core-split of the
    # q-tile axis (per-core K/V scratch) so both TensorCores stay busy.
    return pl.pallas_call(
        kernel,
        out_shape=jax.ShapeDtypeStruct((B, S, D), x.dtype),
        grid_spec=pltpu.PrefetchScalarGridSpec(
            num_scalar_prefetch=0,
            grid=(B, n_q),
            in_specs=[
                # x: one (1, S, D) block per batch element; constant over qi so
                # it is fetched once per batch element (no duplicate q stream).
                pl.BlockSpec((1, S, D), lambda b, qi: (b, 0, 0)),
                pl.BlockSpec((D, D), lambda b, qi: (0, 0)),    # Wq^T (scaled)
                pl.BlockSpec((D, D), lambda b, qi: (0, 0)),    # Wk^T
                pl.BlockSpec((D, D), lambda b, qi: (0, 0)),    # Wv^T
                pl.BlockSpec((1, D), lambda b, qi: (0, 0)),    # b_q (scaled)
                pl.BlockSpec((1, D), lambda b, qi: (0, 0)),    # b_k
                pl.BlockSpec((1, D), lambda b, qi: (0, 0)),    # b_v
            ],
            out_specs=pl.BlockSpec((1, q_tile, D), lambda b, qi: (b, qi, 0)),
            scratch_shapes=[
                pltpu.VMEM((H, S, hd), cdtype),   # K cache, head-major
                pltpu.VMEM((H, S, hd), cdtype),   # V cache, head-major
            ],
        ),
        compiler_params=pltpu.CompilerParams(
            dimension_semantics=("parallel", "arbitrary"),
            vmem_limit_bytes=vmem_limit),
    )(x, wq_t, wk_t, wv_t, bq_f, bk_f, bv_f)


def mha_reference(x, wq, wk, wv, bq, bk, bv, num_heads=NUM_HEADS):
    """Plain-JAX reference replicating the PyTorch forward exactly."""
    B, S, D = x.shape
    hd = D // num_heads
    q = x @ wq.T + bq
    k = x @ wk.T + bk
    v = x @ wv.T + bv
    q = q.reshape(B, S, num_heads, hd).transpose(0, 2, 1, 3)
    k = k.reshape(B, S, num_heads, hd).transpose(0, 2, 1, 3)
    v = v.reshape(B, S, num_heads, hd).transpose(0, 2, 1, 3)
    attn = jax.nn.softmax(jnp.einsum("bhqd,bhkd->bhqk", q, k) / hd ** 0.5, axis=-1)
    out = jnp.einsum("bhqk,bhkd->bhqd", attn, v)
    return out.transpose(0, 2, 1, 3).reshape(B, S, D)


if __name__ == "__main__":
    B, S, D = 2, 8, 32           # batch=2, seq=8, hidden=32, heads=8 -> head_dim=4
    key = jax.random.PRNGKey(0)
    kx, kq, kk, kv, kbq, kbk, kbv = jax.random.split(key, 7)

    bound = 1.0 / (D ** 0.5)     # PyTorch default Linear init range
    x = jax.random.normal(kx, (B, S, D), dtype=jnp.float32)
    wq = jax.random.uniform(kq, (D, D), jnp.float32, -bound, bound)
    wk = jax.random.uniform(kk, (D, D), jnp.float32, -bound, bound)
    wv = jax.random.uniform(kv, (D, D), jnp.float32, -bound, bound)
    bq = jax.random.uniform(kbq, (1, D), jnp.float32, -bound, bound)
    bk = jax.random.uniform(kbk, (1, D), jnp.float32, -bound, bound)
    bv = jax.random.uniform(kbv, (1, D), jnp.float32, -bound, bound)

    ref = mha_reference(x, wq, wk, wv, bq, bk, bv)

    # f32 path: matches the PyTorch/JAX reference to 1e-5.
    out = multi_head_attention(x, wq, wk, wv, bq, bk, bv)
    out = jax.block_until_ready(out)
    np.testing.assert_allclose(np.asarray(out), np.asarray(ref),
                               rtol=1e-5, atol=1e-5)

    # bf16 fast path: MXU-native operands, softmax kept in f32 inside the kernel.
    out_bf16 = multi_head_attention(x.astype(jnp.bfloat16), wq, wk, wv, bq, bk, bv)
    out_bf16 = jax.block_until_ready(out_bf16)
    np.testing.assert_allclose(np.asarray(out_bf16.astype(jnp.float32)),
                               np.asarray(ref), rtol=5e-2, atol=5e-2)

    print("KERNEL_OK")
</pallas_src>

<mosaic_0001>
module attributes {stable_mosaic.version = 11 : i64} {
  func.func @mha_kernel(%arg0: i32, %arg1: i32, %arg2: memref<1x8x32xf32, #tpu.memory_space<vmem>>, %arg3: memref<32x32xf32, #tpu.memory_space<vmem>>, %arg4: memref<32x32xf32, #tpu.memory_space<vmem>>, %arg5: memref<32x32xf32, #tpu.memory_space<vmem>>, %arg6: memref<1x32xf32, #tpu.memory_space<vmem>>, %arg7: memref<1x32xf32, #tpu.memory_space<vmem>>, %arg8: memref<1x32xf32, #tpu.memory_space<vmem>>, %arg9: memref<1x8x32xf32, #tpu.memory_space<vmem>>, %arg10: memref<8x8x4xf32, #tpu.memory_space<vmem>>, %arg11: memref<8x8x4xf32, #tpu.memory_space<vmem>>) attributes {dimension_semantics = [#tpu.dimension_semantics<parallel>, #tpu.dimension_semantics<arbitrary>], iteration_bounds = array<i64: 2, 1>, scalar_prefetch = 0 : i64, scratch_operands = 2 : i64, tpu.core_type = #tpu.core_type<tc>, window_params = [{transform_indices = @transform_0, window_bounds = array<i64: 1, 8, 32>}, {pipeline_mode = #tpu.pipeline_mode<synchronous>, transform_indices = @transform_1, window_bounds = array<i64: 32, 32>}, {pipeline_mode = #tpu.pipeline_mode<synchronous>, transform_indices = @transform_2, window_bounds = array<i64: 32, 32>}, {pipeline_mode = #tpu.pipeline_mode<synchronous>, transform_indices = @transform_3, window_bounds = array<i64: 32, 32>}, {pipeline_mode = #tpu.pipeline_mode<synchronous>, transform_indices = @transform_4, window_bounds = array<i64: 1, 32>}, {pipeline_mode = #tpu.pipeline_mode<synchronous>, transform_indices = @transform_5, window_bounds = array<i64: 1, 32>}, {pipeline_mode = #tpu.pipeline_mode<synchronous>, transform_indices = @transform_6, window_bounds = array<i64: 1, 32>}, {transform_indices = @transform_7, window_bounds = array<i64: 1, 8, 32>}]} {
    %c0_i32 = arith.constant 0 : i32
    %0 = arith.cmpi eq, %arg1, %c0_i32 : i32
    %1 = arith.extui %0 : i1 to i32
    %c0_i32_0 = arith.constant 0 : i32
    %2 = arith.cmpi ne, %1, %c0_i32_0 : i32
    scf.if %2 {
      %c0_22 = arith.constant 0 : index
      %c0_23 = arith.constant 0 : index
      %c0_24 = arith.constant 0 : index
      %79 = vector.load %arg2[%c0_22, %c0_23, %c0_24] : memref<1x8x32xf32, #tpu.memory_space<vmem>>, vector<1x8x32xf32>
      %80 = vector.shape_cast %79 : vector<1x8x32xf32> to vector<8x32xf32>
      %c0_25 = arith.constant 0 : index
      %c0_26 = arith.constant 0 : index
      %81 = vector.load %arg4[%c0_25, %c0_26] : memref<32x32xf32, #tpu.memory_space<vmem>>, vector<32x32xf32>
      %cst_27 = arith.constant dense<0.000000e+00> : vector<8x32xf32>
      %82 = tpu.matmul %80, %81, %cst_27 {dimension_numbers = #tpu.dot_dimension_numbers<[1], [0], [0], [1], [0, 0, 1, 1], [], []>} : vector<8x32xf32>, vector<32x32xf32>, vector<8x32xf32> -> vector<8x32xf32>
      %c0_28 = arith.constant 0 : index
      %c0_29 = arith.constant 0 : index
      %83 = vector.load %arg7[%c0_28, %c0_29] : memref<1x32xf32, #tpu.memory_space<vmem>>, vector<1x32xf32>
      %84 = vector.broadcast %83 : vector<1x32xf32> to vector<8x32xf32>
      %85 = arith.addf %82, %84 : vector<8x32xf32>
      %86 = vector.extract_strided_slice %85 {offsets = [0, 0], sizes = [8, 4], strides = [1, 1]} : vector<8x32xf32> to vector<8x4xf32>
      %c0_30 = arith.constant 0 : index
      %c0_31 = arith.constant 0 : index
      %c0_32 = arith.constant 0 : index
      %87 = vector.load %arg10[%c0_30, %c0_31, %c0_32] : memref<8x8x4xf32, #tpu.memory_space<vmem>>, vector<1x8x4xf32>
      %88 = vector.shape_cast %87 : vector<1x8x4xf32> to vector<8x4xf32>
      %89 = vector.shape_cast %86 : vector<8x4xf32> to vector<1x8x4xf32>
      tpu.vector_store %arg10[%c0_30, %c0_31, %c0_32], %89 {strides = array<i32>} : memref<8x8x4xf32, #tpu.memory_space<vmem>>, vector<1x8x4xf32>,
      %90 = vector.extract_strided_slice %85 {offsets = [0, 4], sizes = [8, 4], strides = [1, 1]} : vector<8x32xf32> to vector<8x4xf32>
      %c1 = arith.constant 1 : index
      %c0_33 = arith.constant 0 : index
      %c0_34 = arith.constant 0 : index
      %91 = vector.load %arg10[%c1, %c0_33, %c0_34] : memref<8x8x4xf32, #tpu.memory_space<vmem>>, vector<1x8x4xf32>
      %92 = vector.shape_cast %91 : vector<1x8x4xf32> to vector<8x4xf32>
      %93 = vector.shape_cast %90 : vector<8x4xf32> to vector<1x8x4xf32>
      tpu.vector_store %arg10[%c1, %c0_33, %c0_34], %93 {strides = array<i32>} : memref<8x8x4xf32, #tpu.memory_space<vmem>>, vector<1x8x4xf32>,
      %94 = vector.extract_strided_slice %85 {offsets = [0, 8], sizes = [8, 4], strides = [1, 1]} : vector<8x32xf32> to vector<8x4xf32>
      %c2 = arith.constant 2 : index
      %c0_35 = arith.constant 0 : index
      %c0_36 = arith.constant 0 : index
      %95 = vector.load %arg10[%c2, %c0_35, %c0_36] : memref<8x8x4xf32, #tpu.memory_space<vmem>>, vector<1x8x4xf32>
      %96 = vector.shape_cast %95 : vector<1x8x4xf32> to vector<8x4xf32>
      %97 = vector.shape_cast %94 : vector<8x4xf32> to vector<1x8x4xf32>
      tpu.vector_store %arg10[%c2, %c0_35, %c0_36], %97 {strides = array<i32>} : memref<8x8x4xf32, #tpu.memory_space<vmem>>, vector<1x8x4xf32>,
      %98 = vector.extract_strided_slice %85 {offsets = [0, 12], sizes = [8, 4], strides = [1, 1]} : vector<8x32xf32> to vector<8x4xf32>
      %c3 = arith.constant 3 : index
      %c0_37 = arith.constant 0 : index
      %c0_38 = arith.constant 0 : index
      %99 = vector.load %arg10[%c3, %c0_37, %c0_38] : memref<8x8x4xf32, #tpu.memory_space<vmem>>, vector<1x8x4xf32>
      %100 = vector.shape_cast %99 : vector<1x8x4xf32> to vector<8x4xf32>
      %101 = vector.shape_cast %98 : vector<8x4xf32> to vector<1x8x4xf32>
      tpu.vector_store %arg10[%c3, %c0_37, %c0_38], %101 {strides = array<i32>} : memref<8x8x4xf32, #tpu.memory_space<vmem>>, vector<1x8x4xf32>,
      %102 = vector.extract_strided_slice %85 {offsets = [0, 16], sizes = [8, 4], strides = [1, 1]} : vector<8x32xf32> to vector<8x4xf32>
      %c4 = arith.constant 4 : index
      %c0_39 = arith.constant 0 : index
      %c0_40 = arith.constant 0 : index
      %103 = vector.load %arg10[%c4, %c0_39, %c0_40] : memref<8x8x4xf32, #tpu.memory_space<vmem>>, vector<1x8x4xf32>
      %104 = vector.shape_cast %103 : vector<1x8x4xf32> to vector<8x4xf32>
      %105 = vector.shape_cast %102 : vector<8x4xf32> to vector<1x8x4xf32>
      tpu.vector_store %arg10[%c4, %c0_39, %c0_40], %105 {strides = array<i32>} : memref<8x8x4xf32, #tpu.memory_space<vmem>>, vector<1x8x4xf32>,
      %106 = vector.extract_strided_slice %85 {offsets = [0, 20], sizes = [8, 4], strides = [1, 1]} : vector<8x32xf32> to vector<8x4xf32>
      %c5 = arith.constant 5 : index
      %c0_41 = arith.constant 0 : index
      %c0_42 = arith.constant 0 : index
      %107 = vector.load %arg10[%c5, %c0_41, %c0_42] : memref<8x8x4xf32, #tpu.memory_space<vmem>>, vector<1x8x4xf32>
      %108 = vector.shape_cast %107 : vector<1x8x4xf32> to vector<8x4xf32>
      %109 = vector.shape_cast %106 : vector<8x4xf32> to vector<1x8x4xf32>
      tpu.vector_store %arg10[%c5, %c0_41, %c0_42], %109 {strides = array<i32>} : memref<8x8x4xf32, #tpu.memory_space<vmem>>, vector<1x8x4xf32>,
      %110 = vector.extract_strided_slice %85 {offsets = [0, 24], sizes = [8, 4], strides = [1, 1]} : vector<8x32xf32> to vector<8x4xf32>
      %c6 = arith.constant 6 : index
      %c0_43 = arith.constant 0 : index
      %c0_44 = arith.constant 0 : index
      %111 = vector.load %arg10[%c6, %c0_43, %c0_44] : memref<8x8x4xf32, #tpu.memory_space<vmem>>, vector<1x8x4xf32>
      %112 = vector.shape_cast %111 : vector<1x8x4xf32> to vector<8x4xf32>
      %113 = vector.shape_cast %110 : vector<8x4xf32> to vector<1x8x4xf32>
      tpu.vector_store %arg10[%c6, %c0_43, %c0_44], %113 {strides = array<i32>} : memref<8x8x4xf32, #tpu.memory_space<vmem>>, vector<1x8x4xf32>,
      %114 = vector.extract_strided_slice %85 {offsets = [0, 28], sizes = [8, 4], strides = [1, 1]} : vector<8x32xf32> to vector<8x4xf32>
      %c7 = arith.constant 7 : index
      %c0_45 = arith.constant 0 : index
      %c0_46 = arith.constant 0 : index
      %115 = vector.load %arg10[%c7, %c0_45, %c0_46] : memref<8x8x4xf32, #tpu.memory_space<vmem>>, vector<1x8x4xf32>
      %116 = vector.shape_cast %115 : vector<1x8x4xf32> to vector<8x4xf32>
      %117 = vector.shape_cast %114 : vector<8x4xf32> to vector<1x8x4xf32>
      tpu.vector_store %arg10[%c7, %c0_45, %c0_46], %117 {strides = array<i32>} : memref<8x8x4xf32, #tpu.memory_space<vmem>>, vector<1x8x4xf32>,
      %c0_47 = arith.constant 0 : index
      %c0_48 = arith.constant 0 : index
      %118 = vector.load %arg5[%c0_47, %c0_48] : memref<32x32xf32, #tpu.memory_space<vmem>>, vector<32x32xf32>
      %cst_49 = arith.constant dense<0.000000e+00> : vector<8x32xf32>
      %119 = tpu.matmul %80, %118, %cst_49 {dimension_numbers = #tpu.dot_dimension_numbers<[1], [0], [0], [1], [0, 0, 1, 1], [], []>} : vector<8x32xf32>, vector<32x32xf32>, vector<8x32xf32> -> vector<8x32xf32>
      %c0_50 = arith.constant 0 : index
      %c0_51 = arith.constant 0 : index
      %120 = vector.load %arg8[%c0_50, %c0_51] : memref<1x32xf32, #tpu.memory_space<vmem>>, vector<1x32xf32>
      %121 = vector.broadcast %120 : vector<1x32xf32> to vector<8x32xf32>
      %122 = arith.addf %119, %121 : vector<8x32xf32>
      %123 = vector.extract_strided_slice %122 {offsets = [0, 0], sizes = [8, 4], strides = [1, 1]} : vector<8x32xf32> to vector<8x4xf32>
      %c0_52 = arith.constant 0 : index
      %c0_53 = arith.constant 0 : index
      %c0_54 = arith.constant 0 : index
      %124 = vector.load %arg11[%c0_52, %c0_53, %c0_54] : memref<8x8x4xf32, #tpu.memory_space<vmem>>, vector<1x8x4xf32>
      %125 = vector.shape_cast %124 : vector<1x8x4xf32> to vector<8x4xf32>
      %126 = vector.shape_cast %123 : vector<8x4xf32> to vector<1x8x4xf32>
      tpu.vector_store %arg11[%c0_52, %c0_53, %c0_54], %126 {strides = array<i32>} : memref<8x8x4xf32, #tpu.memory_space<vmem>>, vector<1x8x4xf32>,
      %127 = vector.extract_strided_slice %122 {offsets = [0, 4], sizes = [8, 4], strides = [1, 1]} : vector<8x32xf32> to vector<8x4xf32>
      %c1_55 = arith.constant 1 : index
      %c0_56 = arith.constant 0 : index
      %c0_57 = arith.constant 0 : index
      %128 = vector.load %arg11[%c1_55, %c0_56, %c0_57] : memref<8x8x4xf32, #tpu.memory_space<vmem>>, vector<1x8x4xf32>
      %129 = vector.shape_cast %128 : vector<1x8x4xf32> to vector<8x4xf32>
      %130 = vector.shape_cast %127 : vector<8x4xf32> to vector<1x8x4xf32>
      tpu.vector_store %arg11[%c1_55, %c0_56, %c0_57], %130 {strides = array<i32>} : memref<8x8x4xf32, #tpu.memory_space<vmem>>, vector<1x8x4xf32>,
      %131 = vector.extract_strided_slice %122 {offsets = [0, 8], sizes = [8, 4], strides = [1, 1]} : vector<8x32xf32> to vector<8x4xf32>
      %c2_58 = arith.constant 2 : index
      %c0_59 = arith.constant 0 : index
      %c0_60 = arith.constant 0 : index
      %132 = vector.load %arg11[%c2_58, %c0_59, %c0_60] : memref<8x8x4xf32, #tpu.memory_space<vmem>>, vector<1x8x4xf32>
      %133 = vector.shape_cast %132 : vector<1x8x4xf32> to vector<8x4xf32>
      %134 = vector.shape_cast %131 : vector<8x4xf32> to vector<1x8x4xf32>
      tpu.vector_store %arg11[%c2_58, %c0_59, %c0_60], %134 {strides = array<i32>} : memref<8x8x4xf32, #tpu.memory_space<vmem>>, vector<1x8x4xf32>,
      %135 = vector.extract_strided_slice %122 {offsets = [0, 12], sizes = [8, 4], strides = [1, 1]} : vector<8x32xf32> to vector<8x4xf32>
      %c3_61 = arith.constant 3 : index
      %c0_62 = arith.constant 0 : index
      %c0_63 = arith.constant 0 : index
      %136 = vector.load %arg11[%c3_61, %c0_62, %c0_63] : memref<8x8x4xf32, #tpu.memory_space<vmem>>, vector<1x8x4xf32>
      %137 = vector.shape_cast %136 : vector<1x8x4xf32> to vector<8x4xf32>
      %138 = vector.shape_cast %135 : vector<8x4xf32> to vector<1x8x4xf32>
      tpu.vector_store %arg11[%c3_61, %c0_62, %c0_63], %138 {strides = array<i32>} : memref<8x8x4xf32, #tpu.memory_space<vmem>>, vector<1x8x4xf32>,
      %139 = vector.extract_strided_slice %122 {offsets = [0, 16], sizes = [8, 4], strides = [1, 1]} : vector<8x32xf32> to vector<8x4xf32>
      %c4_64 = arith.constant 4 : index
      %c0_65 = arith.constant 0 : index
      %c0_66 = arith.constant 0 : index
      %140 = vector.load %arg11[%c4_64, %c0_65, %c0_66] : memref<8x8x4xf32, #tpu.memory_space<vmem>>, vector<1x8x4xf32>
      %141 = vector.shape_cast %140 : vector<1x8x4xf32> to vector<8x4xf32>
      %142 = vector.shape_cast %139 : vector<8x4xf32> to vector<1x8x4xf32>
      tpu.vector_store %arg11[%c4_64, %c0_65, %c0_66], %142 {strides = array<i32>} : memref<8x8x4xf32, #tpu.memory_space<vmem>>, vector<1x8x4xf32>,
      %143 = vector.extract_strided_slice %122 {offsets = [0, 20], sizes = [8, 4], strides = [1, 1]} : vector<8x32xf32> to vector<8x4xf32>
      %c5_67 = arith.constant 5 : index
      %c0_68 = arith.constant 0 : index
      %c0_69 = arith.constant 0 : index
      %144 = vector.load %arg11[%c5_67, %c0_68, %c0_69] : memref<8x8x4xf32, #tpu.memory_space<vmem>>, vector<1x8x4xf32>
      %145 = vector.shape_cast %144 : vector<1x8x4xf32> to vector<8x4xf32>
      %146 = vector.shape_cast %143 : vector<8x4xf32> to vector<1x8x4xf32>
      tpu.vector_store %arg11[%c5_67, %c0_68, %c0_69], %146 {strides = array<i32>} : memref<8x8x4xf32, #tpu.memory_space<vmem>>, vector<1x8x4xf32>,
      %147 = vector.extract_strided_slice %122 {offsets = [0, 24], sizes = [8, 4], strides = [1, 1]} : vector<8x32xf32> to vector<8x4xf32>
      %c6_70 = arith.constant 6 : index
      %c0_71 = arith.constant 0 : index
      %c0_72 = arith.constant 0 : index
      %148 = vector.load %arg11[%c6_70, %c0_71, %c0_72] : memref<8x8x4xf32, #tpu.memory_space<vmem>>, vector<1x8x4xf32>
      %149 = vector.shape_cast %148 : vector<1x8x4xf32> to vector<8x4xf32>
      %150 = vector.shape_cast %147 : vector<8x4xf32> to vector<1x8x4xf32>
      tpu.vector_store %arg11[%c6_70, %c0_71, %c0_72], %150 {strides = array<i32>} : memref<8x8x4xf32, #tpu.memory_space<vmem>>, vector<1x8x4xf32>,
      %151 = vector.extract_strided_slice %122 {offsets = [0, 28], sizes = [8, 4], strides = [1, 1]} : vector<8x32xf32> to vector<8x4xf32>
      %c7_73 = arith.constant 7 : index
      %c0_74 = arith.constant 0 : index
      %c0_75 = arith.constant 0 : index
      %152 = vector.load %arg11[%c7_73, %c0_74, %c0_75] : memref<8x8x4xf32, #tpu.memory_space<vmem>>, vector<1x8x4xf32>
      %153 = vector.shape_cast %152 : vector<1x8x4xf32> to vector<8x4xf32>
      %154 = vector.shape_cast %151 : vector<8x4xf32> to vector<1x8x4xf32>
      tpu.vector_store %arg11[%c7_73, %c0_74, %c0_75], %154 {strides = array<i32>} : memref<8x8x4xf32, #tpu.memory_space<vmem>>, vector<1x8x4xf32>,
    } else {
    }
    %c8_i32 = arith.constant 8 : i32
    %3 = arith.muli %arg1, %c8_i32 : i32
    %4 = tpu.assume_multiple %3, 8 : i32
    %c0 = arith.constant 0 : index
    %5 = arith.index_cast %4 : i32 to index
    %c0_1 = arith.constant 0 : index
    %6 = vector.load %arg2[%c0, %5, %c0_1] : memref<1x8x32xf32, #tpu.memory_space<vmem>>, vector<1x8x32xf32>
    %7 = vector.shape_cast %6 : vector<1x8x32xf32> to vector<8x32xf32>
    %c0_2 = arith.constant 0 : index
    %c0_3 = arith.constant 0 : index
    %8 = vector.load %arg3[%c0_2, %c0_3] : memref<32x32xf32, #tpu.memory_space<vmem>>, vector<32x32xf32>
    %cst = arith.constant dense<0.000000e+00> : vector<8x32xf32>
    %9 = tpu.matmul %7, %8, %cst {dimension_numbers = #tpu.dot_dimension_numbers<[1], [0], [0], [1], [0, 0, 1, 1], [], []>} : vector<8x32xf32>, vector<32x32xf32>, vector<8x32xf32> -> vector<8x32xf32>
    %c0_4 = arith.constant 0 : index
    %c0_5 = arith.constant 0 : index
    %10 = vector.load %arg6[%c0_4, %c0_5] : memref<1x32xf32, #tpu.memory_space<vmem>>, vector<1x32xf32>
    %11 = vector.broadcast %10 : vector<1x32xf32> to vector<8x32xf32>
    %12 = arith.addf %9, %11 : vector<8x32xf32>
    %13 = vector.extract_strided_slice %12 {offsets = [0, 0], sizes = [8, 4], strides = [1, 1]} : vector<8x32xf32> to vector<8x4xf32>
    %14 = vector.extract_strided_slice %12 {offsets = [0, 4], sizes = [8, 4], strides = [1, 1]} : vector<8x32xf32> to vector<8x4xf32>
    %15 = vector.extract_strided_slice %12 {offsets = [0, 8], sizes = [8, 4], strides = [1, 1]} : vector<8x32xf32> to vector<8x4xf32>
    %16 = vector.extract_strided_slice %12 {offsets = [0, 12], sizes = [8, 4], strides = [1, 1]} : vector<8x32xf32> to vector<8x4xf32>
    %17 = vector.extract_strided_slice %12 {offsets = [0, 16], sizes = [8, 4], strides = [1, 1]} : vector<8x32xf32> to vector<8x4xf32>
    %18 = vector.extract_strided_slice %12 {offsets = [0, 20], sizes = [8, 4], strides = [1, 1]} : vector<8x32xf32> to vector<8x4xf32>
    %19 = vector.extract_strided_slice %12 {offsets = [0, 24], sizes = [8, 4], strides = [1, 1]} : vector<8x32xf32> to vector<8x4xf32>
    %20 = vector.extract_strided_slice %12 {offsets = [0, 28], sizes = [8, 4], strides = [1, 1]} : vector<8x32xf32> to vector<8x4xf32>
    %21 = vector.shape_cast %13 : vector<8x4xf32> to vector<1x8x4xf32>
    %22 = vector.shape_cast %14 : vector<8x4xf32> to vector<1x8x4xf32>
    %23 = vector.shape_cast %15 : vector<8x4xf32> to vector<1x8x4xf32>
    %24 = vector.shape_cast %16 : vector<8x4xf32> to vector<1x8x4xf32>
    %25 = vector.shape_cast %17 : vector<8x4xf32> to vector<1x8x4xf32>
    %26 = vector.shape_cast %18 : vector<8x4xf32> to vector<1x8x4xf32>
    %27 = vector.shape_cast %19 : vector<8x4xf32> to vector<1x8x4xf32>
    %28 = vector.shape_cast %20 : vector<8x4xf32> to vector<1x8x4xf32>
    %29 = tpu.concatenate %21, %22, %23, %24, %25, %26, %27, %28 in 0 : vector<1x8x4xf32>, vector<1x8x4xf32>, vector<1x8x4xf32>, vector<1x8x4xf32>, vector<1x8x4xf32>, vector<1x8x4xf32>, vector<1x8x4xf32>, vector<1x8x4xf32> -> vector<8x8x4xf32>
    %cst_6 = arith.constant 0xFF800000 : f32
    %30 = vector.broadcast %cst_6 : f32 to vector<8x8x1xf32>
    %cst_7 = arith.constant 0.000000e+00 : f32
    %31 = vector.broadcast %cst_7 : f32 to vector<8x8x1xf32>
    %cst_8 = arith.constant 0.000000e+00 : f32
    %32 = vector.broadcast %cst_8 : f32 to vector<8x8x4xf32>
    %c0_i32_9 = arith.constant 0 : i32
    %c8_i32_10 = arith.constant 8 : i32
    %33 = arith.muli %c0_i32_9, %c8_i32_10 : i32
    %34 = tpu.assume_multiple %33, 8 : i32
    %c0_11 = arith.constant 0 : index
    %35 = arith.index_cast %34 : i32 to index
    %c0_12 = arith.constant 0 : index
    %36 = vector.load %arg10[%c0_11, %35, %c0_12] : memref<8x8x4xf32, #tpu.memory_space<vmem>>, vector<8x8x4xf32>
    %c0_13 = arith.constant 0 : index
    %37 = arith.index_cast %34 : i32 to index
    %c0_14 = arith.constant 0 : index
    %38 = vector.load %arg11[%c0_13, %37, %c0_14] : memref<8x8x4xf32, #tpu.memory_space<vmem>>, vector<8x8x4xf32>
    "tpu.trace_start"() <{level = 10 : i32, message = "hqd,hkd->hqk"}> : () -> ()
    %cst_15 = arith.constant dense<0.000000e+00> : vector<8x8x8xf32>
    %39 = tpu.matmul %29, %36, %cst_15 {dimension_numbers = #tpu.dot_dimension_numbers<[2], [2], [1], [1], [0, 0, 0, 1, 1, 1], [0], [0]>} : vector<8x8x4xf32>, vector<8x8x4xf32>, vector<8x8x8xf32> -> vector<8x8x8xf32>
    "tpu.trace_stop"() : () -> ()
    %cst_16 = arith.constant dense<0xFF800000> : vector<8x8xf32>
    %40 = vector.multi_reduction <maximumf>, %39, %cst_16 [2] : vector<8x8x8xf32> to vector<8x8xf32>
    %41 = vector.shape_cast %40 : vector<8x8xf32> to vector<8x8x1xf32>
    %42 = arith.maximumf %30, %41 : vector<8x8x1xf32>
    %43 = arith.subf %30, %42 : vector<8x8x1xf32>
    %44 = math.exp %43 : vector<8x8x1xf32>
    %45 = vector.broadcast %42 : vector<8x8x1xf32> to vector<8x8x8xf32>
    %46 = arith.subf %39, %45 : vector<8x8x8xf32>
    %47 = math.exp %46 : vector<8x8x8xf32>
    %48 = arith.mulf %44, %31 : vector<8x8x1xf32>
    %cst_17 = arith.constant dense<0.000000e+00> : vector<8x8xf32>
    %49 = vector.multi_reduction <add>, %47, %cst_17 [2] : vector<8x8x8xf32> to vector<8x8xf32>
    %50 = vector.shape_cast %49 : vector<8x8xf32> to vector<8x8x1xf32>
    %51 = arith.addf %48, %50 : vector<8x8x1xf32>
    %52 = vector.broadcast %44 : vector<8x8x1xf32> to vector<8x8x4xf32>
    %53 = arith.mulf %52, %32 : vector<8x8x4xf32>
    "tpu.trace_start"() <{level = 10 : i32, message = "hqk,hkd->hqd"}> : () -> ()
    %cst_18 = arith.constant dense<0.000000e+00> : vector<8x8x4xf32>
    %54 = tpu.matmul %47, %38, %cst_18 {dimension_numbers = #tpu.dot_dimension_numbers<[2], [1], [1], [2], [0, 0, 0, 1, 1, 2], [0], [0]>} : vector<8x8x8xf32>, vector<8x8x4xf32>, vector<8x8x4xf32> -> vector<8x8x4xf32>
    "tpu.trace_stop"() : () -> ()
    %55 = arith.addf %53, %54 : vector<8x8x4xf32>
    %c1_i32 = arith.constant 1 : i32
    %56 = tpu.reciprocal %51 : vector<8x8x1xf32> -> vector<8x8x1xf32>
    %57 = vector.broadcast %56 : vector<8x8x1xf32> to vector<8x8x4xf32>
    %58 = arith.mulf %55, %57 : vector<8x8x4xf32>
    %59 = vector.extract_strided_slice %58 {offsets = [0, 0, 0], sizes = [1, 8, 4], strides = [1, 1, 1]} : vector<8x8x4xf32> to vector<1x8x4xf32>
    %60 = vector.shape_cast %59 : vector<1x8x4xf32> to vector<8x4xf32>
    %61 = vector.extract_strided_slice %58 {offsets = [1, 0, 0], sizes = [1, 8, 4], strides = [1, 1, 1]} : vector<8x8x4xf32> to vector<1x8x4xf32>
    %62 = vector.shape_cast %61 : vector<1x8x4xf32> to vector<8x4xf32>
    %63 = vector.extract_strided_slice %58 {offsets = [2, 0, 0], sizes = [1, 8, 4], strides = [1, 1, 1]} : vector<8x8x4xf32> to vector<1x8x4xf32>
    %64 = vector.shape_cast %63 : vector<1x8x4xf32> to vector<8x4xf32>
    %65 = vector.extract_strided_slice %58 {offsets = [3, 0, 0], sizes = [1, 8, 4], strides = [1, 1, 1]} : vector<8x8x4xf32> to vector<1x8x4xf32>
    %66 = vector.shape_cast %65 : vector<1x8x4xf32> to vector<8x4xf32>
    %67 = vector.extract_strided_slice %58 {offsets = [4, 0, 0], sizes = [1, 8, 4], strides = [1, 1, 1]} : vector<8x8x4xf32> to vector<1x8x4xf32>
    %68 = vector.shape_cast %67 : vector<1x8x4xf32> to vector<8x4xf32>
    %69 = vector.extract_strided_slice %58 {offsets = [5, 0, 0], sizes = [1, 8, 4], strides = [1, 1, 1]} : vector<8x8x4xf32> to vector<1x8x4xf32>
    %70 = vector.shape_cast %69 : vector<1x8x4xf32> to vector<8x4xf32>
    %71 = vector.extract_strided_slice %58 {offsets = [6, 0, 0], sizes = [1, 8, 4], strides = [1, 1, 1]} : vector<8x8x4xf32> to vector<1x8x4xf32>
    %72 = vector.shape_cast %71 : vector<1x8x4xf32> to vector<8x4xf32>
    %73 = vector.extract_strided_slice %58 {offsets = [7, 0, 0], sizes = [1, 8, 4], strides = [1, 1, 1]} : vector<8x8x4xf32> to vector<1x8x4xf32>
    %74 = vector.shape_cast %73 : vector<1x8x4xf32> to vector<8x4xf32>
    %75 = tpu.concatenate %60, %62, %64, %66, %68, %70, %72, %74 in 1 : vector<8x4xf32>, vector<8x4xf32>, vector<8x4xf32>, vector<8x4xf32>, vector<8x4xf32>, vector<8x4xf32>, vector<8x4xf32>, vector<8x4xf32> -> vector<8x32xf32>
    %c0_19 = arith.constant 0 : index
    %c0_20 = arith.constant 0 : index
    %c0_21 = arith.constant 0 : index
    %76 = vector.load %arg9[%c0_19, %c0_20, %c0_21] : memref<1x8x32xf32, #tpu.memory_space<vmem>>, vector<1x8x32xf32>
    %77 = vector.shape_cast %76 : vector<1x8x32xf32> to vector<8x32xf32>
    %78 = vector.shape_cast %75 : vector<8x32xf32> to vector<1x8x32xf32>
    tpu.vector_store %arg9[%c0_19, %c0_20, %c0_21], %78 {strides = array<i32>} : memref<1x8x32xf32, #tpu.memory_space<vmem>>, vector<1x8x32xf32>,
    return
  }
  func.func @transform_0(%arg0: i32, %arg1: i32) -> (i32, i32, i32) {
    %c0_i32 = arith.constant 0 : i32
    %c0_i32_0 = arith.constant 0 : i32
    %c0_i32_1 = arith.constant 0 : i32
    return %arg0, %c0_i32, %c0_i32_0 : i32, i32, i32
  }
  func.func @transform_1(%arg0: i32, %arg1: i32) -> (i32, i32) {
    %c0_i32 = arith.constant 0 : i32
    %c0_i32_0 = arith.constant 0 : i32
    %c0_i32_1 = arith.constant 0 : i32
    return %c0_i32, %c0_i32_0 : i32, i32
  }
  func.func @transform_2(%arg0: i32, %arg1: i32) -> (i32, i32) {
    %c0_i32 = arith.constant 0 : i32
    %c0_i32_0 = arith.constant 0 : i32
    %c0_i32_1 = arith.constant 0 : i32
    return %c0_i32, %c0_i32_0 : i32, i32
  }
  func.func @transform_3(%arg0: i32, %arg1: i32) -> (i32, i32) {
    %c0_i32 = arith.constant 0 : i32
    %c0_i32_0 = arith.constant 0 : i32
    %c0_i32_1 = arith.constant 0 : i32
    return %c0_i32, %c0_i32_0 : i32, i32
  }
  func.func @transform_4(%arg0: i32, %arg1: i32) -> (i32, i32) {
    %c0_i32 = arith.constant 0 : i32
    %c0_i32_0 = arith.constant 0 : i32
    %c0_i32_1 = arith.constant 0 : i32
    return %c0_i32, %c0_i32_0 : i32, i32
  }
  func.func @transform_5(%arg0: i32, %arg1: i32) -> (i32, i32) {
    %c0_i32 = arith.constant 0 : i32
    %c0_i32_0 = arith.constant 0 : i32
    %c0_i32_1 = arith.constant 0 : i32
    return %c0_i32, %c0_i32_0 : i32, i32
  }
  func.func @transform_6(%arg0: i32, %arg1: i32) -> (i32, i32) {
    %c0_i32 = arith.constant 0 : i32
    %c0_i32_0 = arith.constant 0 : i32
    %c0_i32_1 = arith.constant 0 : i32
    return %c0_i32, %c0_i32_0 : i32, i32
  }
  func.func @transform_7(%arg0: i32, %arg1: i32) -> (i32, i32, i32) {
    %c0_i32 = arith.constant 0 : i32
    %c0_i32_0 = arith.constant 0 : i32
    return %arg0, %arg1, %c0_i32 : i32, i32, i32
  }
}

</mosaic_0001>

<bundles_post_ra>
// kernel: tpu_custom_call.1
= control target key start
LH: loop header
LB: loop body
LE: loop exit
PB: predicated region body
PF: predicated region fallthrough
CT: control target
= control target key end

     0   :  { %s3345_s0 = inlined_call_operand.hbm [shape: f32[2,8,32], index: 0, kind: input, shape index: {}]   ;;  %s3346_s1 = inlined_call_operand.hbm [shape: f32[32,32], index: 1, kind: input, shape index: {}]   ;;  %s3347_s2 = inlined_call_operand.hbm [shape: f32[32,32], index: 2, kind: input, shape index: {}]   ;;  %s3348_s3 = inlined_call_operand.hbm [shape: f32[32,32], index: 3, kind: input, shape index: {}]   ;;  %s3349_s4 = inlined_call_operand.vmem [shape: f32[1,32], index: 4, kind: input, shape index: {}]   ;;  %s3350_s5 = inlined_call_operand.vmem [shape: f32[1,32], index: 5, kind: input, shape index: {}]   ;;  %s3351_s6 = inlined_call_operand.vmem [shape: f32[1,32], index: 6, kind: input, shape index: {}]   ;;  %s3352_s7 = inlined_call_operand.hbm [shape: f32[2,8,32], index: 7, kind: output, shape index: {}]  }
   0x1   :  { %3360 = sst [smem:[#allocation20_spill]] %s3352_s7 }
   0x2   :  { %12 = vsyncpa [#allocation5], 0 }
   0x3   :  { %14 = vsyncpa [#allocation5 + $0x1], 0 }
   0x4   :  { %15 = vsyncpa [#allocation8], 0 }
   0x5   :  { %16 = vsyncpa [#allocation11], 0 }
   0x6   :  { %17 = vsyncpa [#allocation6], 0 }
   0x7   :  { %19 = vsyncpa [#allocation6 + $0x1], 0  ;;  %s2862_s24 = smov 0   ;;  %s2864_s25 = smov 0  }
   0x8   :  { %s2866_s26 = smov 0   ;;  %s2868_s27 = smov 0  }
   0x9   :  { %s2870_s28 = smov 0   ;;  %s2872_s29 = smov 0  }
   0xa LB: > { %3361 = sst [smem:[#allocation17_spill]] %s2776_s24  ;;  %s2205_s30 = sadd.s32 4294967295, %s2796_s29   ;;  %s2796_s29 = sphi %s2872_s29, %s25_s29   ;;  %s2792_s28 = sphi %s2870_s28, %s3387_s28   ;;  %s2788_s27 = sphi %s2868_s27, %s3386_s27   ;;  %s2784_s26 = sphi %s2866_s26, %s3385_s26   ;;  %s2780_s25 = sphi %s2864_s25, %s3384_s25   ;;  %s2776_s24 = sphi %s2862_s24, %s3383_s24  }
   0xb   : > { %3362 = sst [smem:[#allocation18_spill]] %s2788_s27  ;;  %s2206_s8 = sadd.s32 4294967294, %s2796_s29  }
   0xc   : > { %p57_p0 = scmp.ne.s32.totalorder %s2780_s25, %s2776_s24  ;;  %p2896_p1 = scmp.eq.s32.totalorder %s2205_s30, 0 }
   0xd   : > { %p2900_p2 = scmp.eq.s32.totalorder %s2205_s30, 1  ;;  %p215_p3 = scmp.eq.s32.totalorder %s2206_s8, 1 }
   0xe   : > { %s3363_s9 = scalar_select %p2896_p1, 1, 0 }
   0xf   : > { %s3364_s10 = scalar_select %p2900_p2, 1, 0 }
  0x10   : > { %p2906_p4 = por %p2896_p1, %p57_p0  ;;  %p2207_p5 = scmp.ge.s32.totalorder %s2796_s29, 1 }
  0x11   : > { %p2911_p6 = por %p215_p3, %p57_p0  ;;  %p222_p7 = scmp.lt.s32.totalorder %s2796_s29, 3 }
  0x12   : > { %s3365_s11 = scalar_select %p2906_p4, 1, 0 }
  0x13   : > { %s3366_s12 = scalar_select %p2911_p6, 1, 0 }
  0x14   : > { %p2916_p8 = pnand %p2207_p5, %p222_p7  ;;  %s2798_s14 = smov [#allocation7]  }
  0x15   : > { %3367 = sst [smem:[#allocation19_spill]] %s3366_s12  ;;  %s234_s15 = sshll.u32 %s2798_s14, 4  ;;  %s2920_s15 = int_to_ptr.vmem [resolvable:$true] %s234_s15 }
  0x16   : > { %s3368_s13 = scalar_select %p2916_p8, 1, 0 }
  0x17   : > { %p2448_p9 = pneg %p2916_p8  ;;  %s2799_s17 = smov [#allocation9]  }
  0x18   : > { %s247_s18 = sshll.u32 %s2799_s17, 4  ;;  %s2800_s19 = smov [#allocation10]   ;;  %s2931_s18 = int_to_ptr.vmem [resolvable:$true] %s247_s18 }
  0x19   : > { %p2927_p11 = pnand %p2448_p9, %p2896_p1  ;;  %s2933_s20 = sshll.u32 %s2800_s19, 4  ;;  %s261_s20 = int_to_ptr.vmem [resolvable:$true] %s2933_s20 }
  0x1a   : > { %s2592_s23 = scalar_lea.hbm %s3346_s1, 512 }
  0x1b   : > { %p2593_p12 = scmp.ne.s32.totalorder %s3346_s1, %s2592_s23  ;;  %p2943_p13 = pneg %p2927_p11 }
  0x1c   : > { %p2599_p5 = scmp.lt.u32.totalorder %s2592_s23, %s3346_s1 }
  0x1d   : > { %p2595_p0 = pnand %p2943_p13, %p2593_p12 }
  0x1f   : > { %p2596_p3 = pneg %p2595_p0 }
  0x21   : > { %p2601_p7 = pnand %p2599_p5, %p2596_p3 }
  0x23   : > { %2604 = shalt.err (!%p2601_p7)
}
  0x24   : > { %s2605_s21 = scalar_lea.vmem %s2920_s15, 512  ;;  %p2613_p1 = scmp.lt.s32.totalorder %s2920_s15, %s2920_s15 }
  0x25   : > { %p2606_p9 = scmp.ne.s32.totalorder %s2920_s15, %s2605_s21  ;;  %p2614_p4 = scmp.lt.s32.totalorder %s2605_s21, %s2605_s21 }
  0x27   : > { %p2608_p10 = pnand %p2606_p9, %p2943_p13  ;;  %p2615_p12 = por %p2614_p4, %p2613_p1 }
  0x29   : > { %p2609_p6 = pneg %p2608_p10 }
  0x2b   : > { %p2616_p0 = pnand %p2615_p12, %p2609_p6 }
  0x2d   : > { %2619 = shalt.err (!%p2616_p0)
}
  0x2e   : > { %s2801_s22 = smov 128   ;;  %s2802_s23 = smov 8  }
  0x2f   : > { %2451 = dma.hbm_to_vmem [thread:$0]  (!%p2927_p11), %s3346_s1, 512, %s2920_s15, [#allocation8], %s2801_s22, %s2801_s22, %s2802_s23  }
  0x30   : > { %s2620_s21 = scalar_lea.hbm %s3347_s2, 512 }
  0x31   : > { %p2621_p1 = scmp.ne.s32.totalorder %s3347_s2, %s2620_s21  ;;  %p2627_p10 = scmp.lt.u32.totalorder %s2620_s21, %s3347_s2 }
  0x33   : > { %p2623_p4 = pnand %p2621_p1, %p2943_p13 }
  0x35   : > { %p2624_p6 = pneg %p2623_p4 }
  0x37   : > { %p2629_p3 = pnand %p2627_p10, %p2624_p6 }
  0x39   : > { %2632 = shalt.err (!%p2629_p3)
}
  0x3a   : > { %s2633_s15 = scalar_lea.vmem %s2931_s18, 512  ;;  %p2641_p12 = scmp.lt.s32.totalorder %s2931_s18, %s2931_s18 }
  0x3b   : > { %p2634_p5 = scmp.ne.s32.totalorder %s2931_s18, %s2633_s15  ;;  %p2642_p0 = scmp.lt.s32.totalorder %s2633_s15, %s2633_s15 }
  0x3d   : > { %p2636_p7 = pnand %p2634_p5, %p2943_p13  ;;  %p2643_p1 = por %p2642_p0, %p2641_p12 }
  0x3f   : > { %p2637_p9 = pneg %p2636_p7 }
  0x41   : > { %p2644_p4 = pnand %p2643_p1, %p2637_p9 }
  0x43   : > { %2647 = shalt.err (!%p2644_p4)
}
  0x44   : > { %2454 = dma.hbm_to_vmem [thread:$0]  (!%p2927_p11), %s3347_s2, 512, %s2931_s18, [#allocation8], %s2801_s22, %s2801_s22, %s2802_s23  }
  0x45   : > { %s2648_s30 = scalar_lea.hbm %s3348_s3, 512 }
  0x46   : > { %p2649_p6 = scmp.ne.s32.totalorder %s3348_s3, %s2648_s30  ;;  %p2655_p5 = scmp.lt.u32.totalorder %s2648_s30, %s3348_s3 }
  0x48   : > { %p2651_p10 = pnand %p2649_p6, %p2943_p13 }
  0x4a   : > { %p2652_p3 = pneg %p2651_p10 }
  0x4c   : > { %p2657_p7 = pnand %p2655_p5, %p2652_p3 }
  0x4e   : > { %2660 = shalt.err (!%p2657_p7)
}
  0x4f   : > { %s2661_s15 = scalar_lea.vmem %s261_s20, 512  ;;  %p2669_p1 = scmp.lt.s32.totalorder %s261_s20, %s261_s20 }
  0x50   : > { %p2662_p9 = scmp.ne.s32.totalorder %s261_s20, %s2661_s15  ;;  %p2670_p4 = scmp.lt.s32.totalorder %s2661_s15, %s2661_s15 }
  0x52   : > { %p2664_p12 = pnand %p2662_p9, %p2943_p13  ;;  %p2671_p8 = por %p2670_p4, %p2669_p1 }
  0x54   : > { %p2665_p0 = pneg %p2664_p12 }
  0x56   : > { %p2672_p2 = pnand %p2671_p8, %p2665_p0 }
  0x58   : > { %2675 = shalt.err (!%p2672_p2)
}
  0x59   : > { %2457 = dma.hbm_to_vmem [thread:$0]  (!%p2927_p11), %s3348_s3, 512, %s261_s20, [#allocation11], %s2801_s22, %s2801_s22, %s2802_s23  }
  0x5a   : > { %s44_s14 = sadd.s32 1, %s2784_s26  ;;  %s37_s16 = sadd.s32 1, %s2792_s28 }
  0x5b   : > { %p51_p2 = scmp.ne.s32.totalorder %s2784_s26, %s2780_s25  ;;  %p39_p8 = scmp.ge.s32.totalorder %s37_s16, 2 }
  0x5c   : > { %p52_p13 = scmp.eq.s32.totalorder %s2796_s29, 0  ;;  %p3371_p6 = scmp.ne.s32.totalorder %s3364_s10, 0 }
  0x5d   : > { %p2469_p3 = scmp.lt.s32.totalorder %s2796_s29, 2  ;;  %s3389_s16 = smov (%p39_p8, %s37_s16), 0 }
  0x5e   : > { %p3022_p10 = por %p3371_p6, %p51_p2  ;;  %p53_p5 = por %p52_p13, %p51_p2 }
  0x5f   : > { %s283_s27 = sand.u32 1, %s2784_s26   ;;  %s41_s12 = ssub.s32 %s2792_s28, %s3389_s16 }
  0x60   : > { %p42_p7 = scmp.eq.s32.totalorder %s41_s12, 0  ;;  %s2212_s20 = sshll.u32 %s283_s27, 3 }
  0x61   : > { %s2213_s22 = sshll.u32 %s2792_s28, 7  ;;  %s287_s17 = scalar_lea.vmem [#allocation4], %s2212_s20 }
  0x62   : > { %s3034_s23 = scalar_select %p42_p7, %s2784_s26, %s44_s14  }
  0x63   : > { %s3039_s10 = scalar_lea.hbm %s3345_s0, %s2213_s22  ;;  %s294_s19 = sshll.u32 %s287_s17, 4  ;;  %s3041_s19 = int_to_ptr.vmem [resolvable:$true] %s294_s19 }
  0x64   : > { %p3045_p11 = pnand %p2469_p3, %p53_p5  ;;  %s284_s15 = scalar_lea.sflag [#allocation5], %s283_s27 }
  0x65   : > { %s2676_s18 = scalar_lea.hbm %s3039_s10, 128  ;;  %s2681_s12 = scalar_lea.hbm %s3345_s0, 256 }
  0x66   : > { %p2677_p9 = scmp.ne.s32.totalorder %s3039_s10, %s2676_s18  ;;  %p2678_p12 = pneg %p3045_p11 }
  0x67   : > { %p2682_p4 = scmp.lt.u32.totalorder %s3039_s10, %s3345_s0  ;;  %p2683_p2 = scmp.lt.u32.totalorder %s2681_s12, %s2676_s18 }
  0x68   : > { %p2679_p0 = pnand %p2678_p12, %p2677_p9  ;;  %p2685_p13 = scmp.lt.u32.totalorder %s2676_s18, %s3039_s10 }
  0x69   : > { %p2684_p8 = por %p2683_p2, %p2682_p4 }
  0x6a   : > { %p2680_p1 = pneg %p2679_p0 }
  0x6b   : > { %p2686_p6 = por %p2685_p13, %p2684_p8 }
  0x6d   : > { %p2687_p3 = pnand %p2686_p6, %p2680_p1 }
  0x6f   : > { %2690 = shalt.err (!%p2687_p3)
}
  0x70   : > { %s2691_s27 = scalar_lea.vmem %s3041_s19, 128  ;;  %s2803_s30 = smov [#allocation4]  }
  0x71   : > { %p2692_p5 = scmp.ne.s32.totalorder %s3041_s19, %s2691_s27  ;;  %s2696_s8 = sshll.u32 %s2803_s30, 4  ;;  %s2697_s8 = int_to_ptr.vmem [resolvable:$false] %s2696_s8 }
  0x72   : > { %s2698_s17 = scalar_lea.vmem %s2697_s8, 256  ;;  %p2699_p0 = scmp.lt.s32.totalorder %s3041_s19, %s2697_s8 }
  0x73   : > { %p2694_p7 = pnand %p2692_p5, %p2678_p12  ;;  %p2700_p4 = scmp.lt.s32.totalorder %s2698_s17, %s2691_s27 }
  0x75   : > { %p2695_p9 = pneg %p2694_p7  ;;  %p2701_p2 = por %p2700_p4, %p2699_p0 }
  0x77   : > { %p2702_p8 = pnand %p2701_p2, %p2695_p9 }
  0x79   : > { %2705 = shalt.err (!%p2702_p8)
}
  0x7a   : > { %2461 = dma.hbm_to_vmem [thread:$0]  (!%p3045_p11), %s3039_s10, 128, %s3041_s19, %s284_s15  }
  0x7b   : > { %p3374_p1 = scmp.ne.s32.totalorder %s3368_s13, 0 }
  0x7c   : > { %s3077_s18 = sand.u32 (!%p3374_p1), 1, %s2780_s25   ;;  %p3375_p12 = scmp.ne.s32.totalorder (!%p3374_p1), %s3365_s11, 0 }
  0x7d   : > { %303 = sbr.rel (%p3374_p1) target bundleno = 1223 (0x4c7), region = 48  ;;  %s2215_s7 = sshll.u32 (!%p3374_p1), %s3077_s18, 3 }
  0x7e   : > { %s306_s14 = scalar_lea.sflag (!%p3374_p1), [#allocation5], %s3077_s18  ;;  %s3083_s12 = scalar_lea.vmem (!%p3374_p1), [#allocation4], %s2215_s7 }
  0x84   : > { %2759 = dma.done.wait (%p3375_p12), %s306_s14, 128  }
  0x85   : > { %2761 = vsyncadd (%p3375_p12), %s306_s14, 4294967168  ;;  %p3376_p11 = scmp.ne.s32.totalorder %s3363_s9, 0 }
  0x87   : > { %2763 = dma.done.wait (%p3376_p11), [#allocation8], 1024  }
  0x88   : > { %2765 = vsyncadd (%p3376_p11), [#allocation8], 4294966272 }
  0x89   : > { %2767 = dma.done.wait (%p3376_p11), [#allocation11], 512  }
  0x8a   : > { %2769 = vsyncadd (%p3376_p11), [#allocation11], 4294966784  ;;  %v2804_v0 = vmov 0.0|0.0   ;;  %vm2805_vm0 = vmmov 0   ;;  %v2806_v1 = vmov 0.0   ;;  %v357_v2 = vld [vmem:[#allocation9] sm:$0xff] }
  0x8b   : > { %2414 = vmatprep.subr.bf16.mxu0 %v2804_v0  ;;  %2309 = vmatprep.mubr.msk.f32.mxu0 %vm2805_vm0, %v2806_v1  ;;  %v358_v3 = vld [vmem:[#allocation9 + $0x8] sm:$0xff]  ;;  %v359_v4 = vld [vmem:[#allocation9 + $0x10] sm:$0xff]  ;;  %v360_v6 = vld [vmem:[#allocation9 + $0x18] sm:$0xff]  ;;  %vm368_vm1 = vcmask 261120   ;;  %vm442_vm2 = vcmask 31744   ;;  %s2807_s13 = smov 116  }
  0x8c   : > { %2420 = vmatprep.subr.bf16.mxu1 %v2804_v0  ;;  %2320 = vmatprep.mubr.msk.f32.mxu1 %vm2805_vm0, %v2806_v1  ;;  %v2415_v5 = vpack.c.bf16 %v358_v3, %v357_v2  ;;  %v2418_v7 = vpack.c.bf16 %v360_v6, %v359_v4  ;;  %v480_v8 = vld [vmem:[#allocation10] sm:$0xff]  ;;  %v481_v9 = vld [vmem:[#allocation10 + $0x8] sm:$0xff]  ;;  %v482_v10 = vld [vmem:[#allocation10 + $0x10] sm:$0xff]  ;;  %s2808_s10 = smov 124   ;;  %s2809_s19 = smov 112   ;;  %vm1318_vm3 = vcmask 64512  }
  0x8d   : > { %v601_v11 = vld [vmem:[#allocation7] sm:$0xff]  ;;  %v602_v12 = vld [vmem:[#allocation7 + $0x8] sm:$0xff]  ;;  %v2421_v13 = vpack.c.bf16 %v481_v9, %v480_v8  ;;  %v483_v14 = vld [vmem:[#allocation10 + $0x18] sm:$0xff]  ;;  %s2810_s21 = smov 120   ;;  %s2811_s22 = smov 104   ;;  %vm2069_vm4 = vcmask 97280  }
  0x8e   : > { %2416 = vmatpush3.bf16.msra.mxu0 %v2415_v5  ;;  %v2424_v15 = vpack.c.bf16 %v483_v14, %v482_v10  ;;  %v356_v16 = vld [vmem:[%s3083_s12] sm:$0xff]  ;;  %v2427_v17 = vpack.c.bf16 %v602_v12, %v601_v11  ;;  %s2812_s27 = smov 108   ;;  %s2813_s30 = smov 100   ;;  %vm2071_vm5 = vcmask 130048   ;;  %vm2073_vm6 = vcmask 162816  }
  0x8f   : > { %2417 = vmatprep.subr.bf16.mxu0 %v2804_v0  ;;  %2422 = vmatpush3.bf16.msra.mxu1 %v2421_v13  ;;  %v603_v18 = vld [vmem:[#allocation7 + $0x10] sm:$0xff]  ;;  %v604_v19 = vld [vmem:[#allocation7 + $0x18] sm:$0xff]  ;;  %s2814_s14 = smov 4   ;;  %s2815_s12 = smov 8   ;;  %vm2075_vm7 = vcmask 195584   ;;  %vm2077_vm8 = vcmask 228352  }
  0x90   : > { %2423 = vmatprep.subr.bf16.mxu1 %v2804_v0  ;;  %v2430_v20 = vpack.c.bf16 %v604_v19, %v603_v18  ;;  %v2220_v21 = vld [vmem:[%s3350_s5] ss:$0 sm:$0xff]  ;;  %s2816_s9 = smov 12   ;;  %s2817_s11 = smov 16  }
  0x91   : > { %v2224_v25 = vld [vmem:[%s3349_s4] ss:$0 sm:$0xff]  ;;  %s351_s20 = scalar_lea.vmem [#allocation12], %s2215_s7  ;;  %s3378_s8 = sld [smem:[#allocation20_spill]] }
  0x92   : > { %2419 = vmatpush3.bf16.msra.mxu0 %v2418_v7  ;;  %v2222_v30 = vld [vmem:[%s3351_s6] ss:$0 sm:$0xff] }
  0x93   : > { %2426 = vmatprep.subr.bf16.mxu0 %v2804_v0  ;;  %2425 = vmatpush3.bf16.msra.mxu1 %v2424_v15 }
  0x94   : > { %2334 = vmatprep.subr.mxu1 %v2806_v1 }
  0x95   : > { %2310 = vmatmul.mubr.msk.f32.vlgmr.msra.gmra.mrb[0].mxu0 %vm368_vm1, %v356_v16 }
  0x96   : > { %2428 = vmatpush3.bf16.msra.mxu0 %v2427_v17  ;;  %2331 = vmatprep.mubr.msk.f32.mxu0 %vm2805_vm0, %v2806_v1 }
  0x97   : > { %2429 = vmatprep.subr.bf16.mxu0 %v2804_v0  ;;  %2321 = vmatmul.mubr.msk.f32.vlgmr.msra.gmra.mrb[0].mxu1 %vm368_vm1, %v356_v16 }
  0x98   : > { %2336 = vmatprep.mubr.msk.f32.mxu1 %vm2805_vm0, %v2806_v1 }
  0x9a   : > { %2431 = vmatpush3.bf16.msra.mxu0 %v2430_v20 }
  0x9b   : > { %2344 = vmatprep.subr.mxu0 %v2806_v1 }
  0x9d   : > { %2332 = vmatmul.mubr.msk.f32.vlgmr.msra.gmra.mrb[2].mxu0 %vm368_vm1, %v356_v16 }
  0x9e   : > { %2346 = vmatprep.mubr.msk.f32.mxu0 %vm2805_vm0, %v2806_v1 }
 0x168   : > { %v438_v22 = vpop.f32.mrb[0].mxu0 }
 0x169   : > { %v439_v23 = vadd.f32 %v2220_v21, %v438_v22  ;;  %v2311_v24 = vpop.f32.mrb[1].mxu0 }
 0x16a   : > { %v557_v31 = vpop.f32.mrb[0].mxu1 }
 0x16b   : > { %443 = vst.msk [vmem:[#allocation2] sm:$0xff] %vm442_vm2, %v439_v23  ;;  %455 = vrot.lane.b32.xlu1 %v439_v23, %s2807_s13  ;;  %445 = vrot.lane.b32.xlu0 %v439_v23, %s2808_s10  ;;  %v3135_v32 = vadd.f32 %v2222_v30, %v557_v31  ;;  %v2322_v33 = vpop.f32.mrb[1].mxu1 }
 0x16d   : > { %561 = vst.msk [vmem:[#allocation3] sm:$0xff] %vm442_vm2, %v3135_v32 }
 0x16f   : > { %460 = vrot.lane.b32.xlu1 %v439_v23, %s2809_s19  ;;  %450 = vrot.lane.b32.xlu0 %v439_v23, %s2810_s21 }
 0x170   : > { %v682_v26 = vpop.f32.mrb[2].mxu0 }
 0x171   : > { %v2333_v27 = vpop.f32.mrb[3].mxu0  ;;  %v683_v29 = vadd.f32 %v2224_v25, %v682_v26 }
 0x172   : > { %v701_v28 = vld [vmem:[#allocation2] sm:$0xff] }
 0x173   : > { %470 = vrot.lane.b32.xlu1 %v439_v23, %s2811_s22  ;;  %465 = vrot.lane.b32.xlu0 %v439_v23, %s2812_s27 }
 0x174   : > { %2335 = vmatpush3.xpose.msk.msra.mxu1 %vm442_vm2, %v701_v28  ;;  %v709_v54 = vld [vmem:[#allocation3] sm:$0xff] }
 0x175   : > { %2339 = vmatprep.subr.mxu1 %v2806_v1 }
 0x177   : > { %2337 = vmatmul.mubr.msk.f32.vlgmr.msra.gmra.mrb[2].mxu1 %vm442_vm2, %v683_v29  ;;  %475 = vrot.lane.b32.xlu1 %v439_v23, %s2813_s30 }
 0x178   : > { %687 = vrot.lane.b32.xlu0 %v683_v29, %s2808_s10  ;;  %2341 = vmatprep.mubr.msk.f32.mxu1 %vm2805_vm0, %v2806_v1 }
 0x17b   : > { %691 = vrot.lane.b32.xlu1 %v683_v29, %s2807_s13 }
 0x17c   : > { %689 = vrot.lane.b32.xlu0 %v683_v29, %s2810_s21 }
 0x17f   : > { %695 = vrot.lane.b32.xlu1 %v683_v29, %s2812_s27 }
 0x180   : > { %693 = vrot.lane.b32.xlu0 %v683_v29, %s2809_s19 }
 0x183   : > { %699 = vrot.lane.b32.xlu1 %v683_v29, %s2813_s30 }
 0x184   : > { %697 = vrot.lane.b32.xlu0 %v683_v29, %s2811_s22 }
 0x187   : > { %563 = vrot.lane.b32.xlu1 %v3135_v32, %s2808_s10  ;;  %s2819_s10 = smov 24  }
 0x188   : > { %568 = vrot.lane.b32.xlu0 %v3135_v32, %s2810_s21  ;;  %s3377_s21 = sld [smem:[#allocation18_spill]] }
 0x18b   : > { %573 = vrot.lane.b32.xlu1 %v3135_v32, %s2807_s13  ;;  %s2818_s13 = smov 20  }
 0x18c   : > { %583 = vrot.lane.b32.xlu0 %v3135_v32, %s2812_s27 }
 0x18e   : > { %s2251_s15 = sshll.u32 %s3377_s21, 7 }
 0x18f   : > { %578 = vrot.lane.b32.xlu1 %v3135_v32, %s2809_s19  ;;  %s2820_s19 = smov 28   ;;  %s3295_s17 = scalar_lea.hbm %s3378_s8, %s2251_s15 }
 0x1dd   : > { %v456_v34 = vpop.permute.xlu1 %455  ;;  %v446_v35 = vpop.permute.xlu0 %445 }
 0x1de   : > { %459 = vst.msk [vmem:[#allocation2 + $0x18] sm:$0xff] %vm442_vm2, %v456_v34  ;;  %449 = vst.msk [vmem:[#allocation2 + $0x8] sm:$0xff] %vm442_vm2, %v446_v35 }
 0x1e1   : > { %v461_v36 = vpop.permute.xlu1 %460  ;;  %v451_v37 = vpop.permute.xlu0 %450 }
 0x1e2   : > { %464 = vst.msk [vmem:[#allocation2 + $0x20] sm:$0xff] %vm442_vm2, %v461_v36  ;;  %454 = vst.msk [vmem:[#allocation2 + $0x10] sm:$0xff] %vm442_vm2, %v451_v37 }
 0x1e5   : > { %v471_v38 = vpop.permute.xlu1 %470  ;;  %v466_v39 = vpop.permute.xlu0 %465  ;;  %v702_v40 = vld [vmem:[#allocation2 + $0x8] sm:$0xff]  ;;  %v704_v44 = vld [vmem:[#allocation2 + $0x18] sm:$0xff] }
 0x1e6   : > { %474 = vst.msk [vmem:[#allocation2 + $0x30] sm:$0xff] %vm442_vm2, %v471_v38  ;;  %469 = vst.msk [vmem:[#allocation2 + $0x28] sm:$0xff] %vm442_vm2, %v466_v39  ;;  %2340 = vmatpush3.xpose.msk.msra.mxu1 %vm442_vm2, %v702_v40 }
 0x1e7   : > { %2349 = vmatprep.subr.mxu1 %v2806_v1 }
 0x1e9   : > { %v476_v41 = vpop.permute.xlu1 %475  ;;  %v703_v42 = vld [vmem:[#allocation2 + $0x10] sm:$0xff]  ;;  %v705_v48 = vld [vmem:[#allocation2 + $0x20] sm:$0xff] }
 0x1ea   : > { %479 = vst.msk [vmem:[#allocation2 + $0x38] sm:$0xff] %vm442_vm2, %v476_v41  ;;  %v688_v43 = vpop.permute.xlu0 %687  ;;  %2345 = vmatpush3.xpose.msk.msra.mxu0 %vm442_vm2, %v703_v42 }
 0x1eb   : > { %2342 = vmatmul.mubr.msk.f32.vlgmr.msra.gmra.mrb[4].mxu1 %vm442_vm2, %v688_v43  ;;  %2354 = vmatprep.subr.mxu0 %v2806_v1 }
 0x1ec   : > { %2350 = vmatpush3.xpose.msk.msra.mxu1 %vm442_vm2, %v704_v44  ;;  %2351 = vmatprep.mubr.msk.f32.mxu1 %vm2805_vm0, %v2806_v1 }
 0x1ed   : > { %v692_v45 = vpop.permute.xlu1 %691  ;;  %2359 = vmatprep.subr.mxu1 %v2806_v1  ;;  %v706_v46 = vld [vmem:[#allocation2 + $0x28] sm:$0xff]  ;;  %v707_v52 = vld [vmem:[#allocation2 + $0x30] sm:$0xff] }
 0x1ee   : > { %v690_v47 = vpop.permute.xlu0 %689 }
 0x1ef   : > { %2347 = vmatmul.mubr.msk.f32.vlgmr.msra.gmra.mrb[4].mxu0 %vm442_vm2, %v690_v47  ;;  %2352 = vmatmul.mubr.msk.f32.vlgmr.msra.gmra.mrb[6].mxu1 %vm442_vm2, %v692_v45 }
 0x1f0   : > { %2355 = vmatpush3.xpose.msk.msra.mxu0 %vm442_vm2, %v705_v48  ;;  %2360 = vmatpush3.xpose.msk.msra.mxu1 %vm442_vm2, %v706_v46 }
 0x1f1   : > { %v696_v49 = vpop.permute.xlu1 %695  ;;  %2356 = vmatprep.mubr.msk.f32.mxu0 %vm2805_vm0, %v2806_v1  ;;  %2364 = vmatprep.subr.mxu0 %v2806_v1  ;;  %v708_v50 = vld [vmem:[#allocation2 + $0x38] sm:$0xff] }
 0x1f2   : > { %v694_v51 = vpop.permute.xlu0 %693  ;;  %2361 = vmatprep.mubr.msk.f32.mxu1 %vm2805_vm0, %v2806_v1  ;;  %2369 = vmatprep.subr.mxu1 %v2806_v1 }
 0x1f3   : > { %2357 = vmatmul.mubr.msk.f32.vlgmr.msra.gmra.mrb[6].mxu0 %vm442_vm2, %v694_v51  ;;  %2362 = vmatmul.mubr.msk.f32.vlgmr.msra.gmra.mrb[8].mxu1 %vm442_vm2, %v696_v49 }
 0x1f4   : > { %2365 = vmatpush3.xpose.msk.msra.mxu0 %vm442_vm2, %v707_v52  ;;  %2370 = vmatpush3.xpose.msk.msra.mxu1 %vm442_vm2, %v708_v50 }
 0x1f5   : > { %v700_v53 = vpop.permute.xlu1 %699  ;;  %2366 = vmatprep.mubr.msk.f32.mxu0 %vm2805_vm0, %v2806_v1  ;;  %2371 = vmatprep.mubr.msk.f32.mxu1 %vm2805_vm0, %v2806_v1 }
 0x1f6   : > { %v698_v55 = vpop.permute.xlu0 %697  ;;  %2374 = vmatprep.subr.mxu0 %v2806_v1  ;;  %2379 = vmatprep.subr.mxu1 %v2806_v1 }
 0x1f7   : > { %2367 = vmatmul.mubr.msk.f32.vlgmr.msra.gmra.mrb[8].mxu0 %vm442_vm2, %v698_v55  ;;  %2372 = vmatmul.mubr.msk.f32.vlgmr.msra.gmra.mrb[10].mxu1 %vm442_vm2, %v700_v53 }
 0x1f8   : > { %2375 = vmatpush3.msra.mxu0 %v709_v54  ;;  %2376 = vmatprep.mubr.msk.f32.mxu0 %vm2805_vm0, %v2806_v1 }
 0x1f9   : > { %2384 = vmatprep.subr.mxu0 %v2806_v1  ;;  %2381 = vmatprep.mubr.msk.f32.mxu1 %vm2805_vm0, %v2806_v1  ;;  %v564_v61 = vpop.permute.xlu1 %563 }
 0x1fa   : > { %v569_v59 = vpop.permute.xlu0 %568  ;;  %567 = vst.msk [vmem:[#allocation3 + $0x8] sm:$0xff] %vm442_vm2, %v564_v61 }
 0x1fb   : > { %572 = vst.msk [vmem:[#allocation3 + $0x10] sm:$0xff] %vm442_vm2, %v569_v59 }
 0x1fd   : > { %v574_v62 = vpop.permute.xlu1 %573 }
 0x1fe   : > { %v584_v60 = vpop.permute.xlu0 %583  ;;  %577 = vst.msk [vmem:[#allocation3 + $0x18] sm:$0xff] %vm442_vm2, %v574_v62 }
 0x1ff   : > { %587 = vst.msk [vmem:[#allocation3 + $0x28] sm:$0xff] %vm442_vm2, %v584_v60 }
 0x201   : > { %v579_v63 = vpop.permute.xlu1 %578  ;;  %v710_v0 = vld [vmem:[#allocation3 + $0x8] sm:$0xff] }
 0x202   : > { %582 = vst.msk [vmem:[#allocation3 + $0x20] sm:$0xff] %vm442_vm2, %v579_v63  ;;  %2380 = vmatpush3.msra.mxu1 %v710_v0  ;;  %v711_v26 = vld [vmem:[#allocation3 + $0x10] sm:$0xff] }
 0x203   : > { %2389 = vmatprep.subr.mxu1 %v2806_v1 }
 0x205   : > { %v712_v49 = vld [vmem:[#allocation3 + $0x18] sm:$0xff] }
 0x209   : > { %v713_v55 = vld [vmem:[#allocation3 + $0x20] sm:$0xff] }
 0x24a   : > { %v789_v56 = vpop.f32.mrb[2].mxu1 }
 0x24b   : > { %v2338_v57 = vpop.f32.mrb[3].mxu1  ;;  %v1319_v58 = vsel %vm1318_vm3, %v789_v56, -inf }
 0x24c   : > { %1320 = vmax.xlane.f32.xlu0 %v1319_v58  ;;  %v714_v58 = vld [vmem:[#allocation3 + $0x28] sm:$0xff] }
 0x2be   : > { %v864_v2 = vpop.f32.mrb[4].mxu1 }
 0x2bf   : > { %v2343_v3 = vpop.f32.mrb[5].mxu1  ;;  %v1322_v4 = vsel %vm1318_vm3, %v864_v2, -inf }
 0x2c0   : > { %1323 = vmax.xlane.f32.xlu1 %v1322_v4 }
 0x2c2   : > { %v939_v5 = vpop.f32.mrb[4].mxu0  ;;  %v1014_v6 = vpop.f32.mrb[6].mxu1 }
 0x2c3   : > { %v2348_v7 = vpop.f32.mrb[5].mxu0  ;;  %v2353_v8 = vpop.f32.mrb[7].mxu1  ;;  %v1325_v9 = vsel %vm1318_vm3, %v939_v5, -inf  ;;  %v1328_v14 = vsel %vm1318_vm3, %v1014_v6, -inf }
 0x2c4   : > { %1326 = vmax.xlane.f32.xlu0 %v1325_v9 }
 0x2c6   : > { %v1089_v10 = vpop.f32.mrb[6].mxu0  ;;  %v1164_v11 = vpop.f32.mrb[8].mxu1 }
 0x2c7   : > { %v2358_v12 = vpop.f32.mrb[7].mxu0  ;;  %v2363_v13 = vpop.f32.mrb[9].mxu1  ;;  %v1331_v15 = vsel %vm1318_vm3, %v1089_v10, -inf  ;;  %v1334_v20 = vsel %vm1318_vm3, %v1164_v11, -inf }
 0x2c8   : > { %1329 = vmax.xlane.f32.xlu0 %v1328_v14  ;;  %1332 = vmax.xlane.f32.xlu1 %v1331_v15 }
 0x2ca   : > { %v1239_v16 = vpop.f32.mrb[8].mxu0  ;;  %v1314_v17 = vpop.f32.mrb[10].mxu1 }
 0x2cb   : > { %v2368_v18 = vpop.f32.mrb[9].mxu0  ;;  %v2373_v19 = vpop.f32.mrb[11].mxu1  ;;  %v1337_v21 = vsel %vm1318_vm3, %v1239_v16, -inf  ;;  %v1340_v22 = vsel %vm1318_vm3, %v1314_v17, -inf }
 0x2cc   : > { %1335 = vmax.xlane.f32.xlu0 %v1334_v20  ;;  %1338 = vmax.xlane.f32.xlu1 %v1337_v21 }
 0x2d0   : > { %1341 = vmax.xlane.f32.xlu0 %v1340_v22 }
 0x2d9   : > { %v3210_v23 = vpop.xlane.xlu0 %1320 }
 0x2da   : > { %v1367_v24 = vsub.f32 %v789_v56, %v3210_v23 }
 0x2dc   : > { %v1375_v25 = vmul.f32 1.442695, %v1367_v24 }
 0x2dd   : > { %588 = vrot.lane.b32.xlu1 %v3135_v32, %s2811_s22  ;;  %s2095_s22 = sshll.u32 %s351_s20, 4  ;;  %s3297_s22 = int_to_ptr.vmem [resolvable:$true] %s2095_s22 }
 0x2de   : > { %2544 = vpow2.f32 %v1375_v25  ;;  %s2706_s7 = scalar_lea.vmem %s3297_s22, 128 }
 0x2df   : > { %p2707_p13 = scmp.ne.s32.totalorder %s3297_s22, %s2706_s7 }
 0x2e1   : > { %p2708_p6 = pnand %p2707_p13, %p3022_p10 }
 0x2e3   : > { %p2709_p3 = pneg %p2708_p6 }
 0x2e6   : > { %593 = vrot.lane.b32.xlu0 %v3135_v32, %s2813_s30 }
 0x2e8   : > { %v3217_v27 = vpop.eup %2544 }
 0x2e9   : > { %2377 = vmatmul.mubr.msk.f32.vlgmr.msra.gmra.mrb[10].mxu0 %vm1318_vm3, %v3217_v27  ;;  %v1399_v7 = vsel %vm1318_vm3, %v3217_v27, 0.0 }
 0x2ea   : > { %2385 = vmatpush3.msra.mxu0 %v711_v26  ;;  %2386 = vmatprep.mubr.msk.f32.mxu0 %vm2805_vm0, %v2806_v1 }
 0x2eb   : > { %2394 = vmatprep.subr.mxu0 %v2806_v1 }
 0x34d   : > { %v3224_v28 = vpop.xlane.xlu1 %1323 }
 0x34e   : > { %v1368_v29 = vsub.f32 %v864_v2, %v3224_v28 }
 0x350   : > { %v1377_v30 = vmul.f32 1.442695, %v1368_v29 }
 0x351   : > { %v3227_v31 = vpop.xlane.xlu0 %1326 }
 0x352   : > { %v1369_v32 = vsub.f32 %v939_v5, %v3227_v31  ;;  %2546 = vpow2.f32 %v1377_v30  ;;  %v1345_v12 = vsub.f32 -inf, %v3227_v31 }
 0x354   : > { %v1379_v33 = vmul.f32 1.442695, %v1369_v32  ;;  %v1355_v13 = vmul.f32 1.442695, %v1345_v12 }
 0x355   : > { %v3230_v34 = vpop.xlane.xlu0 %1329  ;;  %v3232_v35 = vpop.xlane.xlu1 %1332 }
 0x356   : > { %v1370_v36 = vsub.f32 %v1014_v6, %v3230_v34  ;;  %2548 = vpow2.f32 %v1379_v33  ;;  %v1371_v37 = vsub.f32 %v1089_v10, %v3232_v35  ;;  %v1344_v10 = vsub.f32 -inf, %v3224_v28 }
 0x357   : > { %v1347_v14 = vsub.f32 -inf, %v3232_v35 }
 0x358   : > { %v1381_v38 = vmul.f32 1.442695, %v1370_v36  ;;  %v1383_v39 = vmul.f32 1.442695, %v1371_v37 }
 0x359   : > { %v3236_v40 = vpop.xlane.xlu0 %1335  ;;  %v3238_v41 = vpop.xlane.xlu1 %1338 }
 0x35a   : > { %v1372_v42 = vsub.f32 %v1164_v11, %v3236_v40  ;;  %2550 = vpow2.f32 %v1381_v38  ;;  %v1373_v43 = vsub.f32 %v1239_v16, %v3238_v41  ;;  %v1353_v11 = vmul.f32 1.442695, %v1344_v10 }
 0x35b   : > { %2552 = vpow2.f32 %v1383_v39  ;;  %v1348_v16 = vsub.f32 -inf, %v3236_v40  ;;  %v1349_v18 = vsub.f32 -inf, %v3238_v41 }
 0x35c   : > { %v1385_v44 = vmul.f32 1.442695, %v1372_v42  ;;  %v2547_v45 = vpop.eup %2546  ;;  %v1387_v46 = vmul.f32 1.442695, %v1373_v43 }
 0x35d   : > { %v3242_v47 = vpop.xlane.xlu0 %1341  ;;  %v589_v48 = vpop.permute.xlu1 %588  ;;  %2382 = vmatmul.mubr.msk.f32.vlgmr.msra.gmra.mrb[12].mxu1 %vm1318_vm3, %v2547_v45  ;;  %v1402_v51 = vsel %vm1318_vm3, %v2547_v45, 0.0  ;;  %v1361_v19 = vmul.f32 1.442695, %v1348_v16  ;;  %v1363_v22 = vmul.f32 1.442695, %v1349_v18 }
 0x35e   : > { %v1374_v50 = vsub.f32 %v1314_v17, %v3242_v47  ;;  %592 = vst.msk [vmem:[#allocation3 + $0x30] sm:$0xff] %vm442_vm2, %v589_v48  ;;  %2554 = vpow2.f32 %v1385_v44  ;;  %2390 = vmatpush3.msra.mxu1 %v712_v49  ;;  %1403 = vadd.xlane.f32.xlu1 %v1402_v51  ;;  %v1359_v17 = vmul.f32 1.442695, %v1347_v14  ;;  %v1350_v20 = vsub.f32 -inf, %v3242_v47 }
 0x35f   : > { %2391 = vmatprep.mubr.msk.f32.mxu1 %vm2805_vm0, %v2806_v1  ;;  %2399 = vmatprep.subr.mxu1 %v2806_v1  ;;  %2556 = vpow2.f32 %v1387_v46 }
 0x360   : > { %v1389_v52 = vmul.f32 1.442695, %v1374_v50  ;;  %v2549_v53 = vpop.eup %2548  ;;  %v1365_v25 = vmul.f32 1.442695, %v1350_v20 }
 0x361   : > { %v594_v54 = vpop.permute.xlu0 %593  ;;  %2387 = vmatmul.mubr.msk.f32.vlgmr.msra.gmra.mrb[12].mxu0 %vm1318_vm3, %v2549_v53  ;;  %v1405_v56 = vsel %vm1318_vm3, %v2549_v53, 0.0 }
 0x362   : > { %597 = vst.msk [vmem:[#allocation3 + $0x38] sm:$0xff] %vm442_vm2, %v594_v54  ;;  %2558 = vpow2.f32 %v1389_v52  ;;  %2395 = vmatpush3.msra.mxu0 %v713_v55  ;;  %1406 = vadd.xlane.f32.xlu0 %v1405_v56 }
 0x363   : > { %2396 = vmatprep.mubr.msk.f32.mxu0 %vm2805_vm0, %v2806_v1  ;;  %2404 = vmatprep.subr.mxu0 %v2806_v1  ;;  %2560 = vpow2.f32 %v1353_v11 }
 0x364   : > { %v2551_v57 = vpop.eup %2550  ;;  %2562 = vpow2.f32 %v1355_v13 }
 0x365   : > { %2392 = vmatmul.mubr.msk.f32.vlgmr.msra.gmra.mrb[14].mxu1 %vm1318_vm3, %v2551_v57  ;;  %v1408_v59 = vsel %vm1318_vm3, %v2551_v57, 0.0  ;;  %v715_v60 = vld [vmem:[#allocation3 + $0x30] sm:$0xff]  ;;  %v2553_v61 = vpop.eup %2552 }
 0x366   : > { %2400 = vmatpush3.msra.mxu1 %v714_v58  ;;  %1409 = vadd.xlane.f32.xlu0 %v1408_v59  ;;  %v1411_v62 = vsel %vm1318_vm3, %v2553_v61, 0.0 }
 0x367   : > { %2397 = vmatmul.mubr.msk.f32.vlgmr.msra.gmra.mrb[14].mxu0 %vm1318_vm3, %v2553_v61  ;;  %2401 = vmatprep.mubr.msk.f32.mxu1 %vm2805_vm0, %v2806_v1 }
 0x368   : > { %v2555_v63 = vpop.eup %2554  ;;  %1412 = vadd.xlane.f32.xlu1 %v1411_v62  ;;  %2405 = vmatpush3.msra.mxu0 %v715_v60 }
 0x369   : > { %v716_v0 = vld [vmem:[#allocation3 + $0x38] sm:$0xff]  ;;  %2406 = vmatprep.mubr.msk.f32.mxu0 %vm2805_vm0, %v2806_v1  ;;  %2402 = vmatmul.mubr.msk.f32.vlgmr.msra.gmra.mrb[16].mxu1 %vm1318_vm3, %v2555_v63  ;;  %v1414_v2 = vsel %vm1318_vm3, %v2555_v63, 0.0  ;;  %v2557_v3 = vpop.eup %2556 }
 0x36a   : > { %2409 = vmatprep.subr.mxu1 %v2806_v1  ;;  %1415 = vadd.xlane.f32.xlu0 %v1414_v2  ;;  %v1417_v4 = vsel %vm1318_vm3, %v2557_v3, 0.0 }
 0x36b   : > { %2407 = vmatmul.mubr.msk.f32.vlgmr.msra.gmra.mrb[16].mxu0 %vm1318_vm3, %v2557_v3  ;;  %2410 = vmatpush3.msra.mxu1 %v716_v0 }
 0x36c   : > { %v2559_v5 = vpop.eup %2558  ;;  %1418 = vadd.xlane.f32.xlu1 %v1417_v4  ;;  %2411 = vmatprep.mubr.msk.f32.mxu1 %vm2805_vm0, %v2806_v1  ;;  %v1346_v1 = vsub.f32 -inf, %v3230_v34 }
 0x36d   : > { %2412 = vmatmul.mubr.msk.f32.vlgmr.msra.gmra.mrb[18].mxu1 %vm1318_vm3, %v2559_v5  ;;  %v1420_v6 = vsel %vm1318_vm3, %v2559_v5, 0.0  ;;  %v2561_v21 = vpop.eup %2560 }
 0x36e   : > { %1421 = vadd.xlane.f32.xlu0 %v1420_v6  ;;  %v1357_v15 = vmul.f32 1.442695, %v1346_v1  ;;  %v1392_v27 = vmul.f32 0.0, %v2561_v21  ;;  %v2563_v28 = vpop.eup %2562 }
 0x36f   : > { %v1393_v31 = vmul.f32 0.0, %v2563_v28 }
 0x370   : > { %1400 = vadd.xlane.f32.xlu1 %v1399_v7  ;;  %2564 = vpow2.f32 %v1357_v15 }
 0x371   : > { %2566 = vpow2.f32 %v1359_v17 }
 0x372   : > { %2568 = vpow2.f32 %v1361_v19 }
 0x373   : > { %2570 = vpow2.f32 %v1363_v22 }
 0x374   : > { %2572 = vpow2.f32 %v1365_v25  ;;  %v1343_v25 = vsub.f32 -inf, %v3210_v23 }
 0x37a   : > { %v2565_v32 = vpop.eup %2564 }
 0x37b   : > { %v2567_v34 = vpop.eup %2566  ;;  %v1394_v36 = vmul.f32 0.0, %v2565_v32 }
 0x37c   : > { %v2569_v37 = vpop.eup %2568  ;;  %v1395_v40 = vmul.f32 0.0, %v2567_v34 }
 0x37d   : > { %v2571_v41 = vpop.eup %2570  ;;  %v1396_v43 = vmul.f32 0.0, %v2569_v37 }
 0x37e   : > { %v2573_v44 = vpop.eup %2572  ;;  %v1397_v47 = vmul.f32 0.0, %v2571_v41 }
 0x37f   : > { %v1398_v54 = vmul.f32 0.0, %v2573_v44 }
 0x3bc   : > { %v3276_v8 = vpop.f32.mrb[10].mxu0 }
 0x3bd   : > { %v2378_v9 = vpop.f32.mrb[11].mxu0 }
 0x3eb   : > { %v1404_v26 = vpop.xlane.xlu1 %1403 }
 0x3ec   : > { %v1424_v29 = vadd.f32 %v1404_v26, %v1392_v27  ;;  %v1351_v26 = vmul.f32 1.442695, %v1343_v25 }
 0x3ee   : > { %2574 = vrcp.f32 %v1424_v29 }
 0x3ef   : > { %v1407_v24 = vpop.xlane.xlu0 %1406 }
 0x3f0   : > { %v1425_v33 = vadd.f32 %v1407_v24, %v1393_v31 }
 0x3f2   : > { %2576 = vrcp.f32 %v1425_v33 }
 0x3f3   : > { %v1410_v30 = vpop.xlane.xlu0 %1409 }
 0x3f4   : > { %v1426_v39 = vadd.f32 %v1410_v30, %v1394_v36 }
 0x3f5   : > { %v1413_v35 = vpop.xlane.xlu1 %1412 }
 0x3f6   : > { %v1427_v42 = vadd.f32 %v1413_v35, %v1395_v40  ;;  %2578 = vrcp.f32 %v1426_v39 }
 0x3f7   : > { %v1416_v38 = vpop.xlane.xlu0 %1415 }
 0x3f8   : > { %v1428_v46 = vadd.f32 %v1416_v38, %v1396_v43  ;;  %v2575_v52 = vpop.eup %2574  ;;  %2580 = vrcp.f32 %v1427_v42 }
 0x3f9   : > { %v1419_v45 = vpop.xlane.xlu1 %1418 }
 0x3fa   : > { %v1429_v53 = vadd.f32 %v1419_v45, %v1397_v47  ;;  %2582 = vrcp.f32 %v1428_v46 }
 0x3fb   : > { %v1422_v49 = vpop.xlane.xlu0 %1421 }
 0x3fc   : > { %v1430_v56 = vadd.f32 %v1422_v49, %v1398_v54  ;;  %v2577_v60 = vpop.eup %2576  ;;  %2584 = vrcp.f32 %v1429_v53 }
 0x3fd   : > { %v1401_v28 = vpop.xlane.xlu1 %1400 }
 0x3fe   : > { %2586 = vrcp.f32 %v1430_v56 }
 0x3ff   : > { %2588 = vpow2.f32 %v1351_v26 }
 0x400   : > { %v2579_v2 = vpop.eup %2578 }
 0x402   : > { %v2581_v7 = vpop.eup %2580 }
 0x404   : > { %v2583_v13 = vpop.eup %2582 }
 0x406   : > { %v2585_v17 = vpop.eup %2584 }
 0x408   : > { %v2587_v22 = vpop.eup %2586 }
 0x430   : > { %v1573_v48 = vpop.f32.mrb[12].mxu1 }
 0x431   : > { %v2016_v50 = vadd.f32 %v1573_v48, %v1392_v27  ;;  %v2383_v51 = vpop.f32.mrb[13].mxu1  ;;  %v2589_v27 = vpop.eup %2588 }
 0x432   : > { %v1391_v29 = vmul.f32 0.0, %v2589_v27 }
 0x433   : > { %v2032_v55 = vmul.f32 %v2575_v52, %v2016_v50 }
 0x434   : > { %v1646_v57 = vpop.f32.mrb[12].mxu0  ;;  %v1423_v30 = vadd.f32 %v1401_v28, %v1391_v29  ;;  %v2015_v32 = vadd.f32 %v3276_v8, %v1391_v29 }
 0x435   : > { %v2017_v58 = vadd.f32 %v1646_v57, %v1393_v31  ;;  %2040 = vrot.lane.b32.xlu0 %v2032_v55, %s2814_s14  ;;  %v2388_v59 = vpop.f32.mrb[13].mxu0  ;;  %s2081_s14 = scalar_lea.sflag [#allocation6], %s3077_s18 }
 0x436   : > { %2590 = vrcp.f32 %v1423_v30 }
 0x437   : > { %v2033_v61 = vmul.f32 %v2577_v60, %v2017_v58 }
 0x438   : > { %v1719_v62 = vpop.f32.mrb[14].mxu1 }
 0x439   : > { %v2018_v63 = vadd.f32 %v1719_v62, %v1394_v36  ;;  %v2393_v0 = vpop.f32.mrb[15].mxu1  ;;  %2044 = vrot.lane.b32.xlu1 %v2033_v61, %s2815_s12  ;;  %s2821_s12 = smov [#allocation12]  }
 0x43a   : > { %v1792_v3 = vpop.f32.mrb[14].mxu0 }
 0x43b   : > { %v2034_v4 = vmul.f32 %v2579_v2, %v2018_v63  ;;  %v2019_v5 = vadd.f32 %v1792_v3, %v1395_v40  ;;  %v2398_v6 = vpop.f32.mrb[15].mxu0 }
 0x43c   : > { %v1865_v9 = vpop.f32.mrb[16].mxu1 }
 0x43d   : > { %v2035_v10 = vmul.f32 %v2581_v7, %v2019_v5  ;;  %v2020_v11 = vadd.f32 %v1865_v9, %v1396_v43  ;;  %v2403_v12 = vpop.f32.mrb[17].mxu1  ;;  %2048 = vrot.lane.b32.xlu1 %v2034_v4, %s2816_s9  ;;  %s2710_s9 = sshll.u32 %s2821_s12, 4  ;;  %s2711_s9 = int_to_ptr.vmem [resolvable:$false] %s2710_s9 }
 0x43e   : > { %v1938_v1 = vpop.f32.mrb[16].mxu0  ;;  %p2713_p5 = scmp.lt.s32.totalorder %s3297_s22, %s2711_s9 }
 0x43f   : > { %v2036_v14 = vmul.f32 %v2583_v13, %v2020_v11  ;;  %v2021_v15 = vadd.f32 %v1938_v1, %v1397_v47  ;;  %2052 = vrot.lane.b32.xlu0 %v2035_v10, %s2817_s11  ;;  %v2408_v16 = vpop.f32.mrb[17].mxu0  ;;  %s2712_s11 = scalar_lea.vmem %s2711_s9, 256 }
 0x440   : > { %v2011_v18 = vpop.f32.mrb[18].mxu1  ;;  %v2591_v31 = vpop.eup %2590  ;;  %p2714_p7 = scmp.lt.s32.totalorder %s2712_s11, %s2706_s7 }
 0x441   : > { %v2037_v19 = vmul.f32 %v2585_v17, %v2021_v15  ;;  %v2022_v20 = vadd.f32 %v2011_v18, %v1398_v54  ;;  %v2413_v21 = vpop.f32.mrb[19].mxu1  ;;  %2056 = vrot.lane.b32.xlu1 %v2036_v14, %s2818_s13  ;;  %v2031_v35 = vmul.f32 %v2591_v31, %v2015_v32 }
 0x442   : > { %p2715_p9 = por %p2714_p7, %p2713_p5 }
 0x443   : > { %v2038_v24 = vmul.f32 %v2587_v22, %v2022_v20  ;;  %2060 = vrot.lane.b32.xlu0 %v2037_v19, %s2819_s10 }
 0x444   : > { %p2716_p0 = pnand %p2715_p9, %p2709_p3 }
 0x445   : > { %2064 = vrot.lane.b32.xlu1 %v2038_v24, %s2820_s19 }
 0x4a7   : > { %v2041_v33 = vpop.permute.xlu0 %2040 }
 0x4a8   : > { %v2067_v36 = vsel %vm442_vm2, %v2031_v35, %v2041_v33 }
 0x4ab   : > { %v2045_v34 = vpop.permute.xlu1 %2044 }
 0x4ac   : > { %v2068_v23 = vsel %vm1318_vm3, %v2067_v36, %v2045_v34 }
 0x4af   : > { %v2049_v37 = vpop.permute.xlu1 %2048 }
 0x4b0   : > { %v2070_v38 = vsel %vm2069_vm4, %v2068_v23, %v2049_v37 }
 0x4b1   : > { %v2053_v39 = vpop.permute.xlu0 %2052 }
 0x4b2   : > { %v2072_v40 = vsel %vm2071_vm5, %v2070_v38, %v2053_v39 }
 0x4b3   : > { %v2057_v41 = vpop.permute.xlu1 %2056 }
 0x4b4   : > { %v2074_v42 = vsel %vm2073_vm6, %v2072_v40, %v2057_v41 }
 0x4b5   : > { %v2061_v8 = vpop.permute.xlu0 %2060 }
 0x4b6   : > { %v2076_v43 = vsel %vm2075_vm7, %v2074_v42, %v2061_v8 }
 0x4b7   : > { %v2065_v44 = vpop.permute.xlu1 %2064 }
 0x4b8   : > { %v2078_v45 = vsel %vm2077_vm8, %v2076_v43, %v2065_v44 }
 0x4b9   : > { %2079 = vst.msk [vmem:[%s351_s20] sm:$0xff] %vm368_vm1, %v2078_v45 }
 0x4ba   : > { %2719 = shalt.err (!%p2716_p0)
}
 0x4bb   : > { %s2720_s18 = scalar_lea.hbm %s3295_s17, 128  ;;  %s2724_s19 = scalar_lea.hbm %s3378_s8, 256 }
 0x4bc   : > { %p2721_p4 = scmp.ne.s32.totalorder %s3295_s17, %s2720_s18  ;;  %p2725_p1 = scmp.lt.u32.totalorder %s3295_s17, %s3378_s8 }
 0x4bd   : > { %p2726_p12 = scmp.lt.u32.totalorder %s2724_s19, %s2720_s18  ;;  %p2728_p13 = scmp.lt.u32.totalorder %s2720_s18, %s3295_s17 }
 0x4be   : > { %p2722_p2 = pnand %p2721_p4, %p3022_p10 }
 0x4bf   : > { %p2727_p11 = por %p2726_p12, %p2725_p1 }
 0x4c0   : > { %p2723_p8 = pneg %p2722_p2 }
 0x4c1   : > { %p2729_p6 = por %p2728_p13, %p2727_p11 }
 0x4c3   : > { %p2730_p3 = pnand %p2729_p6, %p2723_p8 }
 0x4c5   : > { %2733 = shalt.err (!%p2730_p3)
}
 0x4c6   : > { %2446 = dma.vmem_to_hbm [thread:$0]  (%p3022_p10), %s3297_s22, 128, %s3295_s17, %s2081_s14  }
 0x4c7 PF: > { %s3379_s20 = sld [smem:[#allocation17_spill]]  ;;  %s3380_s27 = sld [smem:[#allocation19_spill]] }
 0x4c8   : > { %p3382_p7 = scmp.ge.s32.totalorder %s2796_s29, 2 }
 0x4cd   : > { %s2107_s30 = sand.u32 1, %s3379_s20   ;;  %p3381_p5 = scmp.ne.s32.totalorder %s3380_s27, 0 }
 0x4ce   : > { %s2108_s7 = scalar_lea.sflag [#allocation6], %s2107_s30 }
 0x4cf   : > { %p2463_p9 = pnand %p3382_p7, %p3381_p5 }
 0x4d1   : > { %2771 = dma.done.wait (!%p2463_p9), %s2108_s7, 128  }
 0x4d2   : > { %2773 = vsyncadd (!%p2463_p9), %s2108_s7, 4294967168  ;;  %s25_s29 = sadd.s32 1, %s2796_s29   ;;  %s3383_s24 = smov %s2780_s25 }
 0x4d3   : > { %p22_p0 = scmp.ge.s32.totalorder %s25_s29, 4   ;;  %s3384_s25 = smov %s2784_s26 }
 0x4d4   : > { %s3385_s26 = smov %s3034_s23  ;;  %s3386_s27 = smov %s2792_s28 }
 0x4d5   : > { %s3387_s28 = smov %s3389_s16  ;;  %24 = sbr.rel (!%p22_p0) target bundleno = 10 (0xa), region = 124 }
 0x4dc   :  { %2113 = vsyncpa [#allocation5], 1 }
 0x4dd   :  { %2115 = vsyncpa [#allocation5 + $0x1], 1 }
 0x4de   :  { %2116 = vsyncpa [#allocation8], 1 }
 0x4df   :  { %2117 = vsyncpa [#allocation11], 1 }
 0x4e0   :  { %2118 = vsyncpa [#allocation6], 1 }
 0x4e1   :  { %2120 = vsyncpa [#allocation6 + $0x1], 1 }

</bundles_post_ra>
